<compile_context>
chip_gen: v6e
topology: v6e:2x2x1
jax: 0.10.0
libtpu: 0.0.40
codegen_flags: <defaults>
</compile_context>

<pallas_src>
import functools

import jax
import jax.numpy as jnp
from jax.experimental import pallas as pl
from jax.experimental.pallas import tpu as pltpu

EPS = 1e-5
_F32 = jnp.float32
_BF16 = jnp.bfloat16


def _rup(v, m):
    return ((v + m - 1) // m) * m


# ------------------------------------------------------------------------- kernels
def _pass1_kernel(y_ref, xsub_ref, sig_ref, w2_ref, w11_ref, pp_ref,
                  h2_ref, idmu_ref, idsig_ref, st_ref):
    """conv2 (3x3/s2 via space-to-depth taps) + conv11 identity path + tile moments."""
    _, hp1, wp1, kk = y_ref.shape
    ho, wo = hp1 - 1, wp1 - 1
    mt, cp = h2_ref.shape

    # conv2 as 4 shifted tap matmuls over the 2x2 space-to-depth input (bf16 x bf16 -> f32).
    acc = jnp.zeros((mt, cp), _F32)
    for t, (da, db) in enumerate(((0, 0), (0, 1), (1, 0), (1, 1))):
        tap = y_ref[:, da:da + ho, db:db + wo, :].reshape(mt, kk)
        acc = acc + jnp.dot(tap, w2_ref[t], preferred_element_type=_F32)
    h2 = acc + pp_ref[0:1, :]                                   # + b2
    h2_ref[...] = h2

    # identity path: conv11 (1x1, stride 2) on the mean and (diagonal) variance.
    w11 = w11_ref[...]
    cinp = w11.shape[0]
    xsub = xsub_ref[...].reshape(mt, cinp)
    id_mu = jnp.dot(xsub, w11, preferred_element_type=_F32) + pp_ref[2:3, :]   # + b11
    idmu_ref[...] = id_mu

    w11f = w11.astype(_F32)
    w11sq = (w11f * w11f).astype(w11.dtype)
    sig_in = sig_ref[...].reshape(mt, cinp)
    idsig_ref[...] = jnp.dot(sig_in, w11sq, preferred_element_type=_F32)

    # per-tile first moment + centered second moment (combined across tiles outside).
    inv_mt = 1.0 / mt
    m_h2 = jnp.sum(h2, axis=0, keepdims=True) * inv_mt
    d_h2 = h2 - m_h2
    v_h2 = jnp.sum(d_h2 * d_h2, axis=0, keepdims=True)
    m_id = jnp.sum(id_mu, axis=0, keepdims=True) * inv_mt
    d_id = id_mu - m_id
    v_id = jnp.sum(d_id * d_id, axis=0, keepdims=True)
    st_ref[0] = jnp.concatenate(
        [m_h2, v_h2, m_id, v_id, jnp.zeros((4, cp), _F32)], axis=0)


def _pass2_kernel(h2_ref, w3_ref, pp_ref, bn_ref, h3_ref, st_ref):
    """bn2 (global batch stats) + relu + conv3 (1x1) + per-tile moments of conv3 out."""
    mt, cp = h3_ref.shape
    h2 = h2_ref[...]
    h2n = (h2 - bn_ref[0:1, :]) * (bn_ref[1:2, :] * pp_ref[3:4, :]) + pp_ref[4:5, :]
    h2n = jnp.maximum(h2n, 0.0)
    h3 = jnp.dot(h2n.astype(_BF16), w3_ref[...],
                 preferred_element_type=_F32) + pp_ref[1:2, :]   # + b3
    h3_ref[...] = h3

    inv_mt = 1.0 / mt
    m_h3 = jnp.sum(h3, axis=0, keepdims=True) * inv_mt
    d_h3 = h3 - m_h3
    v_h3 = jnp.sum(d_h3 * d_h3, axis=0, keepdims=True)
    st_ref[0] = jnp.concatenate([m_h3, v_h3, jnp.zeros((6, cp), _F32)], axis=0)


def _pass3_kernel(h3_ref, idmu_ref, idsig_ref, pp_ref, bn_ref, mu_ref, sig_out_ref):
    """bn3 + VDP bn11 + residual add + VDP relu."""
    g3, be3 = pp_ref[5:6, :], pp_ref[6:7, :]
    g11, be11 = pp_ref[7:8, :], pp_ref[8:9, :]
    mean3, inv3 = bn_ref[0:1, :], bn_ref[1:2, :]
    mean11, inv11 = bn_ref[2:3, :], bn_ref[3:4, :]

    h3 = (h3_ref[...] - mean3) * (inv3 * g3) + be3
    id_mu = (idmu_ref[...] - mean11) * (inv11 * g11) + be11
    scale = inv11 * g11
    id_sig = idsig_ref[...] * (scale * scale)

    z = h3 + id_mu
    mu_ref[...] = jnp.maximum(z, 0.0)
    sig_out_ref[...] = jnp.where(z > 0.0, id_sig, 0.0)


# ------------------------------------------------------------------------- wrapper
def _combine_moments(mean_t, m2_t, rows_per_tile, total_rows):
    """Chan's parallel combine of equal-sized per-tile (mean, centered M2) moments."""
    mean = jnp.mean(mean_t, axis=0)
    m2 = jnp.sum(m2_t, axis=0) + rows_per_tile * jnp.sum((mean_t - mean) ** 2, axis=0)
    var = m2 / total_rows          # biased variance, matches train-time BN normalization
    return mean, jax.lax.rsqrt(var + EPS)


def _row(p, cp):
    p = p.reshape(1, -1).astype(_F32)
    return jnp.pad(p, ((0, 0), (0, cp - p.shape[1])))


@functools.partial(jax.jit, static_argnames=("tile_rows",))
def block_forward(x_nchw, sig_nchw, params, tile_rows=512):
    """Block.forward(x, sig) for num_layers=18, stride=2 (training-mode BatchNorm)."""
    # NCHW -> NHWC once at the block boundary.  In a full network keep everything NHWC
    # and drop these transposes entirely (each is a full HBM read+write pass).
    x = jnp.transpose(x_nchw, (0, 2, 3, 1)).astype(_F32)
    sig = jnp.transpose(sig_nchw, (0, 2, 3, 1)).astype(_F32)

    n, h, w, cin = x.shape
    ho, wo = h // 2, w // 2
    cout = params["w2"].shape[0]
    cp = _rup(cout, 128)           # lane-dense output channels
    k4 = 4 * cin
    k4p = _rup(k4, 128)            # lane-dense conv2 contraction dim
    cinp = _rup(cin, 128)          # lane-dense 1x1 contraction dim

    # Space-to-depth view of the padded input:
    #   Y[n, a, b, (2p+q)*cin + c] = xpad[n, 2a+p, 2b+q, c]
    xpad = jnp.pad(x, ((0, 0), (1, 1), (1, 1), (0, 0)))
    y = xpad.reshape(n, ho + 1, 2, wo + 1, 2, cin)
    y = jnp.transpose(y, (0, 1, 3, 2, 4, 5)).reshape(n, ho + 1, wo + 1, k4)
    y = jnp.pad(y, ((0, 0), (0, 0), (0, 0), (0, k4p - k4))).astype(_BF16)

    xsub = jnp.pad(x[:, ::2, ::2, :], ((0, 0),) * 3 + ((0, cinp - cin),)).astype(_BF16)
    sig_sub = jnp.pad(sig[:, ::2, ::2, :], ((0, 0),) * 3 + ((0, cinp - cin),)).astype(_BF16)

    # conv2 weights rearranged for the 2x2 space-to-depth taps:
    #   W'[2a+b, (2p+q)*cin + c, o] = w2[o, c, 2a+p, 2b+q]  (zero where the 3x3 tap is absent)
    w2p = jnp.zeros((cout, cin, 4, 4), _F32).at[:, :, :3, :3].set(params["w2"].astype(_F32))
    w2p = w2p.reshape(cout, cin, 2, 2, 2, 2)
    w2r = jnp.transpose(w2p, (2, 4, 3, 5, 1, 0)).reshape(4, k4, cout)
    w2r = jnp.pad(w2r, ((0, 0), (0, k4p - k4), (0, cp - cout))).astype(_BF16)

    w11 = jnp.transpose(params["w11"][:, :, 0, 0], (1, 0)).astype(_F32)
    w11 = jnp.pad(w11, ((0, cinp - cin), (0, cp - cout))).astype(_BF16)
    w3 = jnp.transpose(params["w3"][:, :, 0, 0], (1, 0)).astype(_F32)
    w3 = jnp.pad(w3, ((0, cp - cout), (0, cp - cout))).astype(_BF16)

    # Packed per-channel parameters: rows = [b2, b3, b11, g2, be2, g3, be3, g11, be11, 0..]
    pp = jnp.concatenate(
        [_row(params[k], cp) for k in
         ("b2", "b3", "b11", "g2", "be2", "g3", "be3", "g11", "be11")]
        + [jnp.zeros((7, cp), _F32)], axis=0)

    # Row tiling: tn whole images per grid step (all tiles are independent -> "parallel").
    rows_per_img = ho * wo
    tn = 1
    for d in range(1, n + 1):
        if n % d == 0 and d * rows_per_img <= max(tile_rows, rows_per_img):
            tn = d
    mt = tn * rows_per_img
    n_tiles = n // tn
    m_total = n * rows_per_img

    cparams = pltpu.CompilerParams(
        dimension_semantics=("parallel",),
        vmem_limit_bytes=32 * 1024 * 1024,   # tiles are sized well below this on v5e/v6e/v7x
    )

    # ---- pass 1: conv2 + identity-path conv11 + per-tile moments ---------------------
    h2, id_mu, id_sig, st1 = pl.pallas_call(
        _pass1_kernel,
        grid=(n_tiles,),
        in_specs=[
            pl.BlockSpec((tn, ho + 1, wo + 1, k4p), lambda i: (i, 0, 0, 0)),
            pl.BlockSpec((tn, ho, wo, cinp), lambda i: (i, 0, 0, 0)),
            pl.BlockSpec((tn, ho, wo, cinp), lambda i: (i, 0, 0, 0)),
            pl.BlockSpec((4, k4p, cp), lambda i: (0, 0, 0)),
            pl.BlockSpec((cinp, cp), lambda i: (0, 0)),
            pl.BlockSpec((16, cp), lambda i: (0, 0)),
        ],
        out_specs=(
            pl.BlockSpec((mt, cp), lambda i: (i, 0)),
            pl.BlockSpec((mt, cp), lambda i: (i, 0)),
            pl.BlockSpec((mt, cp), lambda i: (i, 0)),
            pl.BlockSpec((1, 8, cp), lambda i: (i, 0, 0)),
        ),
        out_shape=(
            jax.ShapeDtypeStruct((m_total, cp), _F32),
            jax.ShapeDtypeStruct((m_total, cp), _F32),
            jax.ShapeDtypeStruct((m_total, cp), _F32),
            jax.ShapeDtypeStruct((n_tiles, 8, cp), _F32),
        ),
        compiler_params=cparams,
    )(y, xsub, sig_sub, w2r, w11, pp)

    mean2, inv2 = _combine_moments(st1[:, 0, :], st1[:, 1, :], mt, m_total)
    mean11, inv11 = _combine_moments(st1[:, 2, :], st1[:, 3, :], mt, m_total)
    bn_a = jnp.concatenate([mean2[None], inv2[None], jnp.zeros((6, cp), _F32)], axis=0)

    # ---- pass 2: bn2 + relu + conv3 + per-tile moments --------------------------------
    h3, st2 = pl.pallas_call(
        _pass2_kernel,
        grid=(n_tiles,),
        in_specs=[
            pl.BlockSpec((mt, cp), lambda i: (i, 0)),
            pl.BlockSpec((cp, cp), lambda i: (0, 0)),
            pl.BlockSpec((16, cp), lambda i: (0, 0)),
            pl.BlockSpec((8, cp), lambda i: (0, 0)),
        ],
        out_specs=(
            pl.BlockSpec((mt, cp), lambda i: (i, 0)),
            pl.BlockSpec((1, 8, cp), lambda i: (i, 0, 0)),
        ),
        out_shape=(
            jax.ShapeDtypeStruct((m_total, cp), _F32),
            jax.ShapeDtypeStruct((n_tiles, 8, cp), _F32),
        ),
        compiler_params=cparams,
    )(h2, w3, pp, bn_a)

    mean3, inv3 = _combine_moments(st2[:, 0, :], st2[:, 1, :], mt, m_total)
    bn_b = jnp.concatenate(
        [mean3[None], inv3[None], mean11[None], inv11[None], jnp.zeros((4, cp), _F32)],
        axis=0)

    # ---- pass 3: bn3 + VDP bn11 + residual add + VDP relu ------------------------------
    mu_flat, sig_flat = pl.pallas_call(
        _pass3_kernel,
        grid=(n_tiles,),
        in_specs=[
            pl.BlockSpec((mt, cp), lambda i: (i, 0)),
            pl.BlockSpec((mt, cp), lambda i: (i, 0)),
            pl.BlockSpec((mt, cp), lambda i: (i, 0)),
            pl.BlockSpec((16, cp), lambda i: (0, 0)),
            pl.BlockSpec((8, cp), lambda i: (0, 0)),
        ],
        out_specs=(
            pl.BlockSpec((mt, cp), lambda i: (i, 0)),
            pl.BlockSpec((mt, cp), lambda i: (i, 0)),
        ),
        out_shape=(
            jax.ShapeDtypeStruct((m_total, cp), _F32),
            jax.ShapeDtypeStruct((m_total, cp), _F32),
        ),
        compiler_params=cparams,
    )(h3, id_mu, id_sig, pp, bn_b)

    mu = mu_flat[:, :cout].reshape(n, ho, wo, cout).transpose(0, 3, 1, 2)
    sigma = sig_flat[:, :cout].reshape(n, ho, wo, cout).transpose(0, 3, 1, 2)
    return mu, sigma


# ------------------------------------------------------------------- pure-JAX reference
def _reference(x_nchw, sig_nchw, params):
    """Same math as the kernels (bf16 matmul operands, f32 accumulation, batch-stat BN)."""
    x = jnp.transpose(x_nchw, (0, 2, 3, 1)).astype(_F32)
    sig = jnp.transpose(sig_nchw, (0, 2, 3, 1)).astype(_F32)
    dn = ("NHWC", "HWIO", "NHWC")

    def bn_train(hh, g, b):
        m = jnp.mean(hh, axis=(0, 1, 2))
        v = jnp.mean((hh - m) ** 2, axis=(0, 1, 2))
        inv = jax.lax.rsqrt(v + EPS)
        return (hh - m) * inv * g.reshape(-1) + b.reshape(-1), inv

    w2 = jnp.transpose(params["w2"], (2, 3, 1, 0)).astype(_BF16)
    h = jax.lax.conv_general_dilated(
        x.astype(_BF16), w2, window_strides=(2, 2), padding=((1, 1), (1, 1)),
        dimension_numbers=dn, preferred_element_type=_F32) + params["b2"].reshape(-1)
    h, _ = bn_train(h, params["g2"], params["be2"])
    h = jnp.maximum(h, 0.0)

    w3 = jnp.transpose(params["w3"], (2, 3, 1, 0)).astype(_BF16)
    h = jax.lax.conv_general_dilated(
        h.astype(_BF16), w3, window_strides=(1, 1), padding="VALID",
        dimension_numbers=dn, preferred_element_type=_F32) + params["b3"].reshape(-1)
    h, _ = bn_train(h, params["g3"], params["be3"])

    xsub = x[:, ::2, ::2, :].astype(_BF16)
    sig_sub = sig[:, ::2, ::2, :].astype(_BF16)
    w11 = jnp.transpose(params["w11"][:, :, 0, 0], (1, 0)).astype(_BF16)
    w11sq = (w11.astype(_F32) ** 2).astype(_BF16)
    id_mu = jnp.einsum("nhwc,ck->nhwk", xsub, w11,
                       preferred_element_type=_F32) + params["b11"].reshape(-1)
    id_sig = jnp.einsum("nhwc,ck->nhwk", sig_sub, w11sq, preferred_element_type=_F32)
    m = jnp.mean(id_mu, axis=(0, 1, 2))
    v = jnp.mean((id_mu - m) ** 2, axis=(0, 1, 2))
    inv = jax.lax.rsqrt(v + EPS)
    id_mu = (id_mu - m) * inv * params["g11"].reshape(-1) + params["be11"].reshape(-1)
    id_sig = id_sig * (inv * params["g11"].reshape(-1)) ** 2

    z = h + id_mu
    mu = jnp.maximum(z, 0.0)
    sig_out = jnp.where(z > 0.0, id_sig, 0.0)
    return jnp.transpose(mu, (0, 3, 1, 2)), jnp.transpose(sig_out, (0, 3, 1, 2))


def init_params(key, in_channels, out_channels):
    """Parameter shapes consistent with Block.__init__ (num_layers=18 path)."""
    k2, k3, k11, kb = jax.random.split(key, 4)
    kb1, kb2, kb3, kg1, kg2, kg3, kq1, kq2, kq3 = jax.random.split(kb, 9)
    f32 = jnp.float32
    return {
        "w2": 0.1 * jax.random.normal(k2, (out_channels, in_channels, 3, 3), f32),
        "b2": 0.05 * jax.random.normal(kb1, (out_channels,), f32),
        "w3": 0.1 * jax.random.normal(k3, (out_channels, out_channels, 1, 1), f32),
        "b3": 0.05 * jax.random.normal(kb2, (out_channels,), f32),
        "w11": 0.1 * jax.random.normal(k11, (out_channels, in_channels, 1, 1), f32),
        "b11": 0.05 * jax.random.normal(kb3, (out_channels,), f32),
        "g2": 1.0 + 0.1 * jax.random.normal(kg1, (out_channels,), f32),
        "be2": 0.1 * jax.random.normal(kq1, (out_channels,), f32),
        "g3": 1.0 + 0.1 * jax.random.normal(kg2, (out_channels,), f32),
        "be3": 0.1 * jax.random.normal(kq2, (out_channels,), f32),
        "g11": 1.0 + 0.1 * jax.random.normal(kg3, (out_channels,), f32),
        "be11": 0.1 * jax.random.normal(kq3, (out_channels,), f32),
    }


if __name__ == "__main__":
    key = jax.random.PRNGKey(0)
    kx, ks, kp = jax.random.split(key, 3)

    batch, in_ch, out_ch, spatial = 2, 4, 8, 16
    x = jax.random.normal(kx, (batch, in_ch, spatial, spatial), jnp.float32)
    sig = jax.random.uniform(ks, (batch, in_ch, spatial, spatial), jnp.float32,
                             minval=0.0, maxval=0.5)
    params = init_params(kp, in_ch, out_ch)

    # tile_rows=64 -> 2 row tiles per pass: exercises the cross-tile BN-stat combine.
    mu, sigma = block_forward(x, sig, params, tile_rows=64)
    jax.block_until_ready((mu, sigma))

    assert mu.shape == (batch, out_ch, spatial // 2, spatial // 2)
    assert sigma.shape == (batch, out_ch, spatial // 2, spatial // 2)
    assert bool(jnp.all(jnp.isfinite(mu))) and bool(jnp.all(jnp.isfinite(sigma)))

    mu_want, sig_want = _reference(x, sig, params)
    assert bool(jnp.allclose(mu, mu_want, rtol=2e-2, atol=2e-2))
    assert bool(jnp.allclose(sigma, sig_want, rtol=2e-2, atol=2e-2))
    print("KERNEL_OK")
</pallas_src>

<mosaic_0001>
module attributes {stable_mosaic.version = 11 : i64} {
  func.func @_pass1_kernel(%arg0: i32, %arg1: memref<1x9x9x128xbf16, #tpu.memory_space<vmem>>, %arg2: memref<1x8x8x128xbf16, #tpu.memory_space<vmem>>, %arg3: memref<1x8x8x128xbf16, #tpu.memory_space<vmem>>, %arg4: memref<4x128x128xbf16, #tpu.memory_space<vmem>>, %arg5: memref<128x128xbf16, #tpu.memory_space<vmem>>, %arg6: memref<16x128xf32, #tpu.memory_space<vmem>>, %arg7: memref<64x128xf32, #tpu.memory_space<vmem>>, %arg8: memref<64x128xf32, #tpu.memory_space<vmem>>, %arg9: memref<64x128xf32, #tpu.memory_space<vmem>>, %arg10: memref<1x8x128xf32, #tpu.memory_space<vmem>>) attributes {dimension_semantics = [#tpu.dimension_semantics<parallel>], iteration_bounds = array<i64: 2>, scalar_prefetch = 0 : i64, scratch_operands = 0 : i64, tpu.core_type = #tpu.core_type<tc>, window_params = [{transform_indices = @transform_0, window_bounds = array<i64: 1, 9, 9, 128>}, {transform_indices = @transform_1, window_bounds = array<i64: 1, 8, 8, 128>}, {transform_indices = @transform_2, window_bounds = array<i64: 1, 8, 8, 128>}, {pipeline_mode = #tpu.pipeline_mode<synchronous>, transform_indices = @transform_3, window_bounds = array<i64: 4, 128, 128>}, {pipeline_mode = #tpu.pipeline_mode<synchronous>, transform_indices = @transform_4, window_bounds = array<i64: 128, 128>}, {pipeline_mode = #tpu.pipeline_mode<synchronous>, transform_indices = @transform_5, window_bounds = array<i64: 16, 128>}, {transform_indices = @transform_6, window_bounds = array<i64: 64, 128>}, {transform_indices = @transform_7, window_bounds = array<i64: 64, 128>}, {transform_indices = @transform_8, window_bounds = array<i64: 64, 128>}, {transform_indices = @transform_9, window_bounds = array<i64: 1, 8, 128>}]} {
    %cst = arith.constant 0.000000e+00 : f32
    %0 = vector.broadcast %cst : f32 to vector<64x128xf32>
    %c0 = arith.constant 0 : index
    %c0_0 = arith.constant 0 : index
    %c0_1 = arith.constant 0 : index
    %c0_2 = arith.constant 0 : index
    %1 = vector.load %arg1[%c0, %c0_0, %c0_1, %c0_2] : memref<1x9x9x128xbf16, #tpu.memory_space<vmem>>, vector<1x8x8x128xbf16>
    %2 = vector.shape_cast %1 : vector<1x8x8x128xbf16> to vector<64x128xbf16>
    %c0_3 = arith.constant 0 : index
    %c0_4 = arith.constant 0 : index
    %c0_5 = arith.constant 0 : index
    %3 = vector.load %arg4[%c0_3, %c0_4, %c0_5] : memref<4x128x128xbf16, #tpu.memory_space<vmem>>, vector<1x128x128xbf16>
    %4 = vector.shape_cast %3 : vector<1x128x128xbf16> to vector<128x128xbf16>
    %cst_6 = arith.constant dense<0.000000e+00> : vector<64x128xf32>
    %5 = tpu.matmul %2, %4, %cst_6 {dimension_numbers = #tpu.dot_dimension_numbers<[1], [0], [0], [1], [0, 0, 1, 1], [], []>} : vector<64x128xbf16>, vector<128x128xbf16>, vector<64x128xf32> -> vector<64x128xf32>
    %6 = arith.addf %0, %5 : vector<64x128xf32>
    %c0_7 = arith.constant 0 : index
    %c0_8 = arith.constant 0 : index
    %c1 = arith.constant 1 : index
    %c0_9 = arith.constant 0 : index
    %7 = vector.load %arg1[%c0_7, %c0_8, %c1, %c0_9] : memref<1x9x9x128xbf16, #tpu.memory_space<vmem>>, vector<1x8x8x128xbf16>
    %8 = vector.shape_cast %7 : vector<1x8x8x128xbf16> to vector<64x128xbf16>
    %c1_10 = arith.constant 1 : index
    %c0_11 = arith.constant 0 : index
    %c0_12 = arith.constant 0 : index
    %9 = vector.load %arg4[%c1_10, %c0_11, %c0_12] : memref<4x128x128xbf16, #tpu.memory_space<vmem>>, vector<1x128x128xbf16>
    %10 = vector.shape_cast %9 : vector<1x128x128xbf16> to vector<128x128xbf16>
    %cst_13 = arith.constant dense<0.000000e+00> : vector<64x128xf32>
    %11 = tpu.matmul %8, %10, %cst_13 {dimension_numbers = #tpu.dot_dimension_numbers<[1], [0], [0], [1], [0, 0, 1, 1], [], []>} : vector<64x128xbf16>, vector<128x128xbf16>, vector<64x128xf32> -> vector<64x128xf32>
    %12 = arith.addf %6, %11 : vector<64x128xf32>
    %c0_14 = arith.constant 0 : index
    %c1_15 = arith.constant 1 : index
    %c0_16 = arith.constant 0 : index
    %c0_17 = arith.constant 0 : index
    %13 = vector.load %arg1[%c0_14, %c1_15, %c0_16, %c0_17] : memref<1x9x9x128xbf16, #tpu.memory_space<vmem>>, vector<1x8x8x128xbf16>
    %14 = vector.shape_cast %13 : vector<1x8x8x128xbf16> to vector<64x128xbf16>
    %c2 = arith.constant 2 : index
    %c0_18 = arith.constant 0 : index
    %c0_19 = arith.constant 0 : index
    %15 = vector.load %arg4[%c2, %c0_18, %c0_19] : memref<4x128x128xbf16, #tpu.memory_space<vmem>>, vector<1x128x128xbf16>
    %16 = vector.shape_cast %15 : vector<1x128x128xbf16> to vector<128x128xbf16>
    %cst_20 = arith.constant dense<0.000000e+00> : vector<64x128xf32>
    %17 = tpu.matmul %14, %16, %cst_20 {dimension_numbers = #tpu.dot_dimension_numbers<[1], [0], [0], [1], [0, 0, 1, 1], [], []>} : vector<64x128xbf16>, vector<128x128xbf16>, vector<64x128xf32> -> vector<64x128xf32>
    %18 = arith.addf %12, %17 : vector<64x128xf32>
    %c0_21 = arith.constant 0 : index
    %c1_22 = arith.constant 1 : index
    %c1_23 = arith.constant 1 : index
    %c0_24 = arith.constant 0 : index
    %19 = vector.load %arg1[%c0_21, %c1_22, %c1_23, %c0_24] : memref<1x9x9x128xbf16, #tpu.memory_space<vmem>>, vector<1x8x8x128xbf16>
    %20 = vector.shape_cast %19 : vector<1x8x8x128xbf16> to vector<64x128xbf16>
    %c3 = arith.constant 3 : index
    %c0_25 = arith.constant 0 : index
    %c0_26 = arith.constant 0 : index
    %21 = vector.load %arg4[%c3, %c0_25, %c0_26] : memref<4x128x128xbf16, #tpu.memory_space<vmem>>, vector<1x128x128xbf16>
    %22 = vector.shape_cast %21 : vector<1x128x128xbf16> to vector<128x128xbf16>
    %cst_27 = arith.constant dense<0.000000e+00> : vector<64x128xf32>
    %23 = tpu.matmul %20, %22, %cst_27 {dimension_numbers = #tpu.dot_dimension_numbers<[1], [0], [0], [1], [0, 0, 1, 1], [], []>} : vector<64x128xbf16>, vector<128x128xbf16>, vector<64x128xf32> -> vector<64x128xf32>
    %24 = arith.addf %18, %23 : vector<64x128xf32>
    %c0_28 = arith.constant 0 : index
    %c0_29 = arith.constant 0 : index
    %25 = vector.load %arg6[%c0_28, %c0_29] : memref<16x128xf32, #tpu.memory_space<vmem>>, vector<1x128xf32>
    %26 = vector.broadcast %25 : vector<1x128xf32> to vector<64x128xf32>
    %27 = arith.addf %24, %26 : vector<64x128xf32>
    %c0_30 = arith.constant 0 : index
    %c0_31 = arith.constant 0 : index
    %28 = vector.load %arg7[%c0_30, %c0_31] : memref<64x128xf32, #tpu.memory_space<vmem>>, vector<64x128xf32>
    tpu.vector_store %arg7[%c0_30, %c0_31], %27 {strides = array<i32>} : memref<64x128xf32, #tpu.memory_space<vmem>>, vector<64x128xf32>,
    %c0_32 = arith.constant 0 : index
    %c0_33 = arith.constant 0 : index
    %29 = vector.load %arg5[%c0_32, %c0_33] : memref<128x128xbf16, #tpu.memory_space<vmem>>, vector<128x128xbf16>
    %c0_34 = arith.constant 0 : index
    %c0_35 = arith.constant 0 : index
    %c0_36 = arith.constant 0 : index
    %c0_37 = arith.constant 0 : index
    %30 = vector.load %arg2[%c0_34, %c0_35, %c0_36, %c0_37] : memref<1x8x8x128xbf16, #tpu.memory_space<vmem>>, vector<1x8x8x128xbf16>
    %31 = vector.shape_cast %30 : vector<1x8x8x128xbf16> to vector<64x128xbf16>
    %cst_38 = arith.constant dense<0.000000e+00> : vector<64x128xf32>
    %32 = tpu.matmul %31, %29, %cst_38 {dimension_numbers = #tpu.dot_dimension_numbers<[1], [0], [0], [1], [0, 0, 1, 1], [], []>} : vector<64x128xbf16>, vector<128x128xbf16>, vector<64x128xf32> -> vector<64x128xf32>
    %c2_39 = arith.constant 2 : index
    %c0_40 = arith.constant 0 : index
    %33 = vector.load %arg6[%c2_39, %c0_40] : memref<16x128xf32, #tpu.memory_space<vmem>>, vector<1x128xf32>
    %34 = vector.broadcast %33 : vector<1x128xf32> to vector<64x128xf32>
    %35 = arith.addf %32, %34 : vector<64x128xf32>
    %c0_41 = arith.constant 0 : index
    %c0_42 = arith.constant 0 : index
    %36 = vector.load %arg8[%c0_41, %c0_42] : memref<64x128xf32, #tpu.memory_space<vmem>>, vector<64x128xf32>
    tpu.vector_store %arg8[%c0_41, %c0_42], %35 {strides = array<i32>} : memref<64x128xf32, #tpu.memory_space<vmem>>, vector<64x128xf32>,
    %37 = arith.extf %29 : vector<128x128xbf16> to vector<128x128xf32>
    %38 = arith.mulf %37, %37 : vector<128x128xf32>
    %39 = arith.truncf %38 : vector<128x128xf32> to vector<128x128xbf16>
    %c0_43 = arith.constant 0 : index
    %c0_44 = arith.constant 0 : index
    %c0_45 = arith.constant 0 : index
    %c0_46 = arith.constant 0 : index
    %40 = vector.load %arg3[%c0_43, %c0_44, %c0_45, %c0_46] : memref<1x8x8x128xbf16, #tpu.memory_space<vmem>>, vector<1x8x8x128xbf16>
    %41 = vector.shape_cast %40 : vector<1x8x8x128xbf16> to vector<64x128xbf16>
    %cst_47 = arith.constant dense<0.000000e+00> : vector<64x128xf32>
    %42 = tpu.matmul %41, %39, %cst_47 {dimension_numbers = #tpu.dot_dimension_numbers<[1], [0], [0], [1], [0, 0, 1, 1], [], []>} : vector<64x128xbf16>, vector<128x128xbf16>, vector<64x128xf32> -> vector<64x128xf32>
    %c0_48 = arith.constant 0 : index
    %c0_49 = arith.constant 0 : index
    %43 = vector.load %arg9[%c0_48, %c0_49] : memref<64x128xf32, #tpu.memory_space<vmem>>, vector<64x128xf32>
    tpu.vector_store %arg9[%c0_48, %c0_49], %42 {strides = array<i32>} : memref<64x128xf32, #tpu.memory_space<vmem>>, vector<64x128xf32>,
    %cst_50 = arith.constant dense<0.000000e+00> : vector<128xf32>
    %44 = vector.multi_reduction <add>, %27, %cst_50 [0] : vector<64x128xf32> to vector<128xf32>
    %45 = vector.shape_cast %44 : vector<128xf32> to vector<1x128xf32>
    %cst_51 = arith.constant 1.562500e-02 : f32
    %46 = vector.broadcast %cst_51 : f32 to vector<1x128xf32>
    %47 = arith.mulf %45, %46 : vector<1x128xf32>
    %48 = vector.broadcast %47 : vector<1x128xf32> to vector<64x128xf32>
    %49 = arith.subf %27, %48 : vector<64x128xf32>
    %50 = arith.mulf %49, %49 : vector<64x128xf32>
    %cst_52 = arith.constant dense<0.000000e+00> : vector<128xf32>
    %51 = vector.multi_reduction <add>, %50, %cst_52 [0] : vector<64x128xf32> to vector<128xf32>
    %52 = vector.shape_cast %51 : vector<128xf32> to vector<1x128xf32>
    %cst_53 = arith.constant dense<0.000000e+00> : vector<128xf32>
    %53 = vector.multi_reduction <add>, %35, %cst_53 [0] : vector<64x128xf32> to vector<128xf32>
    %54 = vector.shape_cast %53 : vector<128xf32> to vector<1x128xf32>
    %cst_54 = arith.constant 1.562500e-02 : f32
    %55 = vector.broadcast %cst_54 : f32 to vector<1x128xf32>
    %56 = arith.mulf %54, %55 : vector<1x128xf32>
    %57 = vector.broadcast %56 : vector<1x128xf32> to vector<64x128xf32>
    %58 = arith.subf %35, %57 : vector<64x128xf32>
    %59 = arith.mulf %58, %58 : vector<64x128xf32>
    %cst_55 = arith.constant dense<0.000000e+00> : vector<128xf32>
    %60 = vector.multi_reduction <add>, %59, %cst_55 [0] : vector<64x128xf32> to vector<128xf32>
    %61 = vector.shape_cast %60 : vector<128xf32> to vector<1x128xf32>
    %cst_56 = arith.constant 0.000000e+00 : f32
    %62 = vector.broadcast %cst_56 : f32 to vector<4x128xf32>
    %63 = tpu.concatenate %47, %52, %56, %61, %62 in 0 : vector<1x128xf32>, vector<1x128xf32>, vector<1x128xf32>, vector<1x128xf32>, vector<4x128xf32> -> vector<8x128xf32>
    %c0_57 = arith.constant 0 : index
    %c0_58 = arith.constant 0 : index
    %c0_59 = arith.constant 0 : index
    %64 = vector.load %arg10[%c0_57, %c0_58, %c0_59] : memref<1x8x128xf32, #tpu.memory_space<vmem>>, vector<1x8x128xf32>
    %65 = vector.shape_cast %64 : vector<1x8x128xf32> to vector<8x128xf32>
    %66 = vector.shape_cast %63 : vector<8x128xf32> to vector<1x8x128xf32>
    tpu.vector_store %arg10[%c0_57, %c0_58, %c0_59], %66 {strides = array<i32>} : memref<1x8x128xf32, #tpu.memory_space<vmem>>, vector<1x8x128xf32>,
    return
  }
  func.func @transform_0(%arg0: i32) -> (i32, i32, i32, i32) {
    %c0_i32 = arith.constant 0 : i32
    %c0_i32_0 = arith.constant 0 : i32
    %c0_i32_1 = arith.constant 0 : i32
    %c0_i32_2 = arith.constant 0 : i32
    return %arg0, %c0_i32, %c0_i32_0, %c0_i32_1 : i32, i32, i32, i32
  }
  func.func @transform_1(%arg0: i32) -> (i32, i32, i32, i32) {
    %c0_i32 = arith.constant 0 : i32
    %c0_i32_0 = arith.constant 0 : i32
    %c0_i32_1 = arith.constant 0 : i32
    %c0_i32_2 = arith.constant 0 : i32
    return %arg0, %c0_i32, %c0_i32_0, %c0_i32_1 : i32, i32, i32, i32
  }
  func.func @transform_2(%arg0: i32) -> (i32, i32, i32, i32) {
    %c0_i32 = arith.constant 0 : i32
    %c0_i32_0 = arith.constant 0 : i32
    %c0_i32_1 = arith.constant 0 : i32
    %c0_i32_2 = arith.constant 0 : i32
    return %arg0, %c0_i32, %c0_i32_0, %c0_i32_1 : i32, i32, i32, i32
  }
  func.func @transform_3(%arg0: i32) -> (i32, i32, i32) {
    %c0_i32 = arith.constant 0 : i32
    %c0_i32_0 = arith.constant 0 : i32
    %c0_i32_1 = arith.constant 0 : i32
    %c0_i32_2 = arith.constant 0 : i32
    return %c0_i32, %c0_i32_0, %c0_i32_1 : i32, i32, i32
  }
  func.func @transform_4(%arg0: i32) -> (i32, i32) {
    %c0_i32 = arith.constant 0 : i32
    %c0_i32_0 = arith.constant 0 : i32
    %c0_i32_1 = arith.constant 0 : i32
    return %c0_i32, %c0_i32_0 : i32, i32
  }
  func.func @transform_5(%arg0: i32) -> (i32, i32) {
    %c0_i32 = arith.constant 0 : i32
    %c0_i32_0 = arith.constant 0 : i32
    %c0_i32_1 = arith.constant 0 : i32
    return %c0_i32, %c0_i32_0 : i32, i32
  }
  func.func @transform_6(%arg0: i32) -> (i32, i32) {
    %c0_i32 = arith.constant 0 : i32
    %c0_i32_0 = arith.constant 0 : i32
    return %arg0, %c0_i32 : i32, i32
  }
  func.func @transform_7(%arg0: i32) -> (i32, i32) {
    %c0_i32 = arith.constant 0 : i32
    %c0_i32_0 = arith.constant 0 : i32
    return %arg0, %c0_i32 : i32, i32
  }
  func.func @transform_8(%arg0: i32) -> (i32, i32) {
    %c0_i32 = arith.constant 0 : i32
    %c0_i32_0 = arith.constant 0 : i32
    return %arg0, %c0_i32 : i32, i32
  }
  func.func @transform_9(%arg0: i32) -> (i32, i32, i32) {
    %c0_i32 = arith.constant 0 : i32
    %c0_i32_0 = arith.constant 0 : i32
    %c0_i32_1 = arith.constant 0 : i32
    return %arg0, %c0_i32, %c0_i32_0 : i32, i32, i32
  }
}

module attributes {stable_mosaic.version = 11 : i64} {
  func.func @_pass2_kernel(%arg0: i32, %arg1: memref<64x128xf32, #tpu.memory_space<vmem>>, %arg2: memref<128x128xbf16, #tpu.memory_space<vmem>>, %arg3: memref<16x128xf32, #tpu.memory_space<vmem>>, %arg4: memref<8x128xf32, #tpu.memory_space<vmem>>, %arg5: memref<64x128xf32, #tpu.memory_space<vmem>>, %arg6: memref<1x8x128xf32, #tpu.memory_space<vmem>>) attributes {dimension_semantics = [#tpu.dimension_semantics<parallel>], iteration_bounds = array<i64: 2>, scalar_prefetch = 0 : i64, scratch_operands = 0 : i64, tpu.core_type = #tpu.core_type<tc>, window_params = [{transform_indices = @transform_0, window_bounds = array<i64: 64, 128>}, {pipeline_mode = #tpu.pipeline_mode<synchronous>, transform_indices = @transform_1, window_bounds = array<i64: 128, 128>}, {pipeline_mode = #tpu.pipeline_mode<synchronous>, transform_indices = @transform_2, window_bounds = array<i64: 16, 128>}, {pipeline_mode = #tpu.pipeline_mode<synchronous>, transform_indices = @transform_3, window_bounds = array<i64: 8, 128>}, {transform_indices = @transform_4, window_bounds = array<i64: 64, 128>}, {transform_indices = @transform_5, window_bounds = array<i64: 1, 8, 128>}]} {
    %c0 = arith.constant 0 : index
    %c0_0 = arith.constant 0 : index
    %0 = vector.load %arg1[%c0, %c0_0] : memref<64x128xf32, #tpu.memory_space<vmem>>, vector<64x128xf32>
    %c0_1 = arith.constant 0 : index
    %c0_2 = arith.constant 0 : index
    %1 = vector.load %arg4[%c0_1, %c0_2] : memref<8x128xf32, #tpu.memory_space<vmem>>, vector<1x128xf32>
    %2 = vector.broadcast %1 : vector<1x128xf32> to vector<64x128xf32>
    %3 = arith.subf %0, %2 : vector<64x128xf32>
    %c1 = arith.constant 1 : index
    %c0_3 = arith.constant 0 : index
    %4 = vector.load %arg4[%c1, %c0_3] : memref<8x128xf32, #tpu.memory_space<vmem>>, vector<1x128xf32>
    %c3 = arith.constant 3 : index
    %c0_4 = arith.constant 0 : index
    %5 = vector.load %arg3[%c3, %c0_4] : memref<16x128xf32, #tpu.memory_space<vmem>>, vector<1x128xf32>
    %6 = arith.mulf %4, %5 : vector<1x128xf32>
    %7 = vector.broadcast %6 : vector<1x128xf32> to vector<64x128xf32>
    %8 = arith.mulf %3, %7 : vector<64x128xf32>
    %c4 = arith.constant 4 : index
    %c0_5 = arith.constant 0 : index
    %9 = vector.load %arg3[%c4, %c0_5] : memref<16x128xf32, #tpu.memory_space<vmem>>, vector<1x128xf32>
    %10 = vector.broadcast %9 : vector<1x128xf32> to vector<64x128xf32>
    %11 = arith.addf %8, %10 : vector<64x128xf32>
    %cst = arith.constant 0.000000e+00 : f32
    %12 = vector.broadcast %cst : f32 to vector<64x128xf32>
    %13 = arith.maximumf %11, %12 : vector<64x128xf32>
    %14 = arith.truncf %13 : vector<64x128xf32> to vector<64x128xbf16>
    %c0_6 = arith.constant 0 : index
    %c0_7 = arith.constant 0 : index
    %15 = vector.load %arg2[%c0_6, %c0_7] : memref<128x128xbf16, #tpu.memory_space<vmem>>, vector<128x128xbf16>
    %cst_8 = arith.constant dense<0.000000e+00> : vector<64x128xf32>
    %16 = tpu.matmul %14, %15, %cst_8 {dimension_numbers = #tpu.dot_dimension_numbers<[1], [0], [0], [1], [0, 0, 1, 1], [], []>} : vector<64x128xbf16>, vector<128x128xbf16>, vector<64x128xf32> -> vector<64x128xf32>
    %c1_9 = arith.constant 1 : index
    %c0_10 = arith.constant 0 : index
    %17 = vector.load %arg3[%c1_9, %c0_10] : memref<16x128xf32, #tpu.memory_space<vmem>>, vector<1x128xf32>
    %18 = vector.broadcast %17 : vector<1x128xf32> to vector<64x128xf32>
    %19 = arith.addf %16, %18 : vector<64x128xf32>
    %c0_11 = arith.constant 0 : index
    %c0_12 = arith.constant 0 : index
    %20 = vector.load %arg5[%c0_11, %c0_12] : memref<64x128xf32, #tpu.memory_space<vmem>>, vector<64x128xf32>
    tpu.vector_store %arg5[%c0_11, %c0_12], %19 {strides = array<i32>} : memref<64x128xf32, #tpu.memory_space<vmem>>, vector<64x128xf32>,
    %cst_13 = arith.constant dense<0.000000e+00> : vector<128xf32>
    %21 = vector.multi_reduction <add>, %19, %cst_13 [0] : vector<64x128xf32> to vector<128xf32>
    %22 = vector.shape_cast %21 : vector<128xf32> to vector<1x128xf32>
    %cst_14 = arith.constant 1.562500e-02 : f32
    %23 = vector.broadcast %cst_14 : f32 to vector<1x128xf32>
    %24 = arith.mulf %22, %23 : vector<1x128xf32>
    %25 = vector.broadcast %24 : vector<1x128xf32> to vector<64x128xf32>
    %26 = arith.subf %19, %25 : vector<64x128xf32>
    %27 = arith.mulf %26, %26 : vector<64x128xf32>
    %cst_15 = arith.constant dense<0.000000e+00> : vector<128xf32>
    %28 = vector.multi_reduction <add>, %27, %cst_15 [0] : vector<64x128xf32> to vector<128xf32>
    %29 = vector.shape_cast %28 : vector<128xf32> to vector<1x128xf32>
    %cst_16 = arith.constant 0.000000e+00 : f32
    %30 = vector.broadcast %cst_16 : f32 to vector<6x128xf32>
    %31 = tpu.concatenate %24, %29, %30 in 0 : vector<1x128xf32>, vector<1x128xf32>, vector<6x128xf32> -> vector<8x128xf32>
    %c0_17 = arith.constant 0 : index
    %c0_18 = arith.constant 0 : index
    %c0_19 = arith.constant 0 : index
    %32 = vector.load %arg6[%c0_17, %c0_18, %c0_19] : memref<1x8x128xf32, #tpu.memory_space<vmem>>, vector<1x8x128xf32>
    %33 = vector.shape_cast %32 : vector<1x8x128xf32> to vector<8x128xf32>
    %34 = vector.shape_cast %31 : vector<8x128xf32> to vector<1x8x128xf32>
    tpu.vector_store %arg6[%c0_17, %c0_18, %c0_19], %34 {strides = array<i32>} : memref<1x8x128xf32, #tpu.memory_space<vmem>>, vector<1x8x128xf32>,
    return
  }
  func.func @transform_0(%arg0: i32) -> (i32, i32) {
    %c0_i32 = arith.constant 0 : i32
    %c0_i32_0 = arith.constant 0 : i32
    return %arg0, %c0_i32 : i32, i32
  }
  func.func @transform_1(%arg0: i32) -> (i32, i32) {
    %c0_i32 = arith.constant 0 : i32
    %c0_i32_0 = arith.constant 0 : i32
    %c0_i32_1 = arith.constant 0 : i32
    return %c0_i32, %c0_i32_0 : i32, i32
  }
  func.func @transform_2(%arg0: i32) -> (i32, i32) {
    %c0_i32 = arith.constant 0 : i32
    %c0_i32_0 = arith.constant 0 : i32
    %c0_i32_1 = arith.constant 0 : i32
    return %c0_i32, %c0_i32_0 : i32, i32
  }
  func.func @transform_3(%arg0: i32) -> (i32, i32) {
    %c0_i32 = arith.constant 0 : i32
    %c0_i32_0 = arith.constant 0 : i32
    %c0_i32_1 = arith.constant 0 : i32
    return %c0_i32, %c0_i32_0 : i32, i32
  }
  func.func @transform_4(%arg0: i32) -> (i32, i32) {
    %c0_i32 = arith.constant 0 : i32
    %c0_i32_0 = arith.constant 0 : i32
    return %arg0, %c0_i32 : i32, i32
  }
  func.func @transform_5(%arg0: i32) -> (i32, i32, i32) {
    %c0_i32 = arith.constant 0 : i32
    %c0_i32_0 = arith.constant 0 : i32
    %c0_i32_1 = arith.constant 0 : i32
    return %arg0, %c0_i32, %c0_i32_0 : i32, i32, i32
  }
}

module attributes {stable_mosaic.version = 11 : i64} {
  func.func @_pass3_kernel(%arg0: i32, %arg1: memref<64x128xf32, #tpu.memory_space<vmem>>, %arg2: memref<64x128xf32, #tpu.memory_space<vmem>>, %arg3: memref<64x128xf32, #tpu.memory_space<vmem>>, %arg4: memref<16x128xf32, #tpu.memory_space<vmem>>, %arg5: memref<8x128xf32, #tpu.memory_space<vmem>>, %arg6: memref<64x128xf32, #tpu.memory_space<vmem>>, %arg7: memref<64x128xf32, #tpu.memory_space<vmem>>) attributes {dimension_semantics = [#tpu.dimension_semantics<parallel>], iteration_bounds = array<i64: 2>, scalar_prefetch = 0 : i64, scratch_operands = 0 : i64, tpu.core_type = #tpu.core_type<tc>, window_params = [{transform_indices = @transform_0, window_bounds = array<i64: 64, 128>}, {transform_indices = @transform_1, window_bounds = array<i64: 64, 128>}, {transform_indices = @transform_2, window_bounds = array<i64: 64, 128>}, {pipeline_mode = #tpu.pipeline_mode<synchronous>, transform_indices = @transform_3, window_bounds = array<i64: 16, 128>}, {pipeline_mode = #tpu.pipeline_mode<synchronous>, transform_indices = @transform_4, window_bounds = array<i64: 8, 128>}, {transform_indices = @transform_5, window_bounds = array<i64: 64, 128>}, {transform_indices = @transform_6, window_bounds = array<i64: 64, 128>}]} {
    %c5 = arith.constant 5 : index
    %c0 = arith.constant 0 : index
    %0 = vector.load %arg4[%c5, %c0] : memref<16x128xf32, #tpu.memory_space<vmem>>, vector<1x128xf32>
    %c6 = arith.constant 6 : index
    %c0_0 = arith.constant 0 : index
    %1 = vector.load %arg4[%c6, %c0_0] : memref<16x128xf32, #tpu.memory_space<vmem>>, vector<1x128xf32>
    %c7 = arith.constant 7 : index
    %c0_1 = arith.constant 0 : index
    %2 = vector.load %arg4[%c7, %c0_1] : memref<16x128xf32, #tpu.memory_space<vmem>>, vector<1x128xf32>
    %c8 = arith.constant 8 : index
    %c0_2 = arith.constant 0 : index
    %3 = vector.load %arg4[%c8, %c0_2] : memref<16x128xf32, #tpu.memory_space<vmem>>, vector<1x128xf32>
    %c0_3 = arith.constant 0 : index
    %c0_4 = arith.constant 0 : index
    %4 = vector.load %arg5[%c0_3, %c0_4] : memref<8x128xf32, #tpu.memory_space<vmem>>, vector<1x128xf32>
    %c1 = arith.constant 1 : index
    %c0_5 = arith.constant 0 : index
    %5 = vector.load %arg5[%c1, %c0_5] : memref<8x128xf32, #tpu.memory_space<vmem>>, vector<1x128xf32>
    %c2 = arith.constant 2 : index
    %c0_6 = arith.constant 0 : index
    %6 = vector.load %arg5[%c2, %c0_6] : memref<8x128xf32, #tpu.memory_space<vmem>>, vector<1x128xf32>
    %c3 = arith.constant 3 : index
    %c0_7 = arith.constant 0 : index
    %7 = vector.load %arg5[%c3, %c0_7] : memref<8x128xf32, #tpu.memory_space<vmem>>, vector<1x128xf32>
    %c0_8 = arith.constant 0 : index
    %c0_9 = arith.constant 0 : index
    %8 = vector.load %arg1[%c0_8, %c0_9] : memref<64x128xf32, #tpu.memory_space<vmem>>, vector<64x128xf32>
    %9 = vector.broadcast %4 : vector<1x128xf32> to vector<64x128xf32>
    %10 = arith.subf %8, %9 : vector<64x128xf32>
    %11 = arith.mulf %5, %0 : vector<1x128xf32>
    %12 = vector.broadcast %11 : vector<1x128xf32> to vector<64x128xf32>
    %13 = arith.mulf %10, %12 : vector<64x128xf32>
    %14 = vector.broadcast %1 : vector<1x128xf32> to vector<64x128xf32>
    %15 = arith.addf %13, %14 : vector<64x128xf32>
    %c0_10 = arith.constant 0 : index
    %c0_11 = arith.constant 0 : index
    %16 = vector.load %arg2[%c0_10, %c0_11] : memref<64x128xf32, #tpu.memory_space<vmem>>, vector<64x128xf32>
    %17 = vector.broadcast %6 : vector<1x128xf32> to vector<64x128xf32>
    %18 = arith.subf %16, %17 : vector<64x128xf32>
    %19 = arith.mulf %7, %2 : vector<1x128xf32>
    %20 = vector.broadcast %19 : vector<1x128xf32> to vector<64x128xf32>
    %21 = arith.mulf %18, %20 : vector<64x128xf32>
    %22 = vector.broadcast %3 : vector<1x128xf32> to vector<64x128xf32>
    %23 = arith.addf %21, %22 : vector<64x128xf32>
    %24 = arith.mulf %7, %2 : vector<1x128xf32>
    %c0_12 = arith.constant 0 : index
    %c0_13 = arith.constant 0 : index
    %25 = vector.load %arg3[%c0_12, %c0_13] : memref<64x128xf32, #tpu.memory_space<vmem>>, vector<64x128xf32>
    %26 = arith.mulf %24, %24 : vector<1x128xf32>
    %27 = vector.broadcast %26 : vector<1x128xf32> to vector<64x128xf32>
    %28 = arith.mulf %25, %27 : vector<64x128xf32>
    %29 = arith.addf %15, %23 : vector<64x128xf32>
    %cst = arith.constant 0.000000e+00 : f32
    %30 = vector.broadcast %cst : f32 to vector<64x128xf32>
    %31 = arith.maximumf %29, %30 : vector<64x128xf32>
    %c0_14 = arith.constant 0 : index
    %c0_15 = arith.constant 0 : index
    %32 = vector.load %arg6[%c0_14, %c0_15] : memref<64x128xf32, #tpu.memory_space<vmem>>, vector<64x128xf32>
    tpu.vector_store %arg6[%c0_14, %c0_15], %31 {strides = array<i32>} : memref<64x128xf32, #tpu.memory_space<vmem>>, vector<64x128xf32>,
    %cst_16 = arith.constant 0.000000e+00 : f32
    %33 = vector.broadcast %cst_16 : f32 to vector<64x128xf32>
    %34 = arith.cmpf ogt, %29, %33 : vector<64x128xf32>
    %cst_17 = arith.constant 0.000000e+00 : f32
    %35 = vector.broadcast %cst_17 : f32 to vector<64x128xf32>
    %36 = arith.select %34, %28, %35 : vector<64x128xi1>, vector<64x128xf32>
    %c0_18 = arith.constant 0 : index
    %c0_19 = arith.constant 0 : index
    %37 = vector.load %arg7[%c0_18, %c0_19] : memref<64x128xf32, #tpu.memory_space<vmem>>, vector<64x128xf32>
    tpu.vector_store %arg7[%c0_18, %c0_19], %36 {strides = array<i32>} : memref<64x128xf32, #tpu.memory_space<vmem>>, vector<64x128xf32>,
    return
  }
  func.func @transform_0(%arg0: i32) -> (i32, i32) {
    %c0_i32 = arith.constant 0 : i32
    %c0_i32_0 = arith.constant 0 : i32
    return %arg0, %c0_i32 : i32, i32
  }
  func.func @transform_1(%arg0: i32) -> (i32, i32) {
    %c0_i32 = arith.constant 0 : i32
    %c0_i32_0 = arith.constant 0 : i32
    return %arg0, %c0_i32 : i32, i32
  }
  func.func @transform_2(%arg0: i32) -> (i32, i32) {
    %c0_i32 = arith.constant 0 : i32
    %c0_i32_0 = arith.constant 0 : i32
    return %arg0, %c0_i32 : i32, i32
  }
  func.func @transform_3(%arg0: i32) -> (i32, i32) {
    %c0_i32 = arith.constant 0 : i32
    %c0_i32_0 = arith.constant 0 : i32
    %c0_i32_1 = arith.constant 0 : i32
    return %c0_i32, %c0_i32_0 : i32, i32
  }
  func.func @transform_4(%arg0: i32) -> (i32, i32) {
    %c0_i32 = arith.constant 0 : i32
    %c0_i32_0 = arith.constant 0 : i32
    %c0_i32_1 = arith.constant 0 : i32
    return %c0_i32, %c0_i32_0 : i32, i32
  }
  func.func @transform_5(%arg0: i32) -> (i32, i32) {
    %c0_i32 = arith.constant 0 : i32
    %c0_i32_0 = arith.constant 0 : i32
    return %arg0, %c0_i32 : i32, i32
  }
  func.func @transform_6(%arg0: i32) -> (i32, i32) {
    %c0_i32 = arith.constant 0 : i32
    %c0_i32_0 = arith.constant 0 : i32
    return %arg0, %c0_i32 : i32, i32
  }
}

</mosaic_0001>

<bundles_post_ra>
// kernel: block_forward.5
= control target key start
LH: loop header
LB: loop body
LE: loop exit
PB: predicated region body
PF: predicated region fallthrough
CT: control target
= control target key end

     0   :  { %s666_s21 = smov 0   ;;  %s847_s0 = inlined_call_operand.vmem [shape: f32[128,128], index: 0, kind: input, shape index: {}]   ;;  %s848_s1 = inlined_call_operand.vmem [shape: f32[128,128], index: 1, kind: input, shape index: {}]   ;;  %s849_s2 = inlined_call_operand.vmem [shape: f32[128,128], index: 2, kind: input, shape index: {}]   ;;  %s850_s3 = inlined_call_operand.vmem [shape: f32[16,128], index: 3, kind: input, shape index: {}]   ;;  %s851_s4 = inlined_call_operand.vmem [shape: f32[8,128], index: 4, kind: input, shape index: {}]   ;;  %s852_s5 = inlined_call_operand.vmem [shape: f32[128,128], index: 5, kind: output, shape index: {0}]   ;;  %s853_s6 = inlined_call_operand.vmem [shape: f32[128,128], index: 6, kind: output, shape index: {1}]  }
   0x1 LB: > { %s594_s22 = sadd.s32 4294967295, %s629_s21   ;;  %p598_p0 = scmp.ge.s32.totalorder %s629_s21, 1  ;;  %s629_s21 = sphi %s666_s21, %s17_s21  }
   0x2   : > { %p238_p1 = scmp.lt.s32.totalorder %s629_s21, 3 }
   0x4   : > { %p239_p2 = pnand %p598_p0, %p238_p1 }
   0x5   : > { %s599_s23 = sshll.u32 (!%p239_p2), %s594_s22, 3 }
   0x6   : > { %242 = sbr.rel (%p239_p2) target bundleno = 42 (0x2a), region = 40  ;;  %p284_p3 = scmp.lt.s32.totalorder (!%p239_p2), %s599_s23, 15 }
   0xb   : > { %v313_v0 = vld [vmem:[%s850_s3 + $0x5] sm:$0x1]  ;;  %v342_v1 = vlaneseq  ;;  %v315_v2 = vld [vmem:[%s850_s3 + $0x7] sm:$0x1]  ;;  %v318_v3 = vld [vmem:[%s851_s4 + $0x1] sm:$0x1] }
   0xc   : > { %s855_s23 = smov (!%p284_p3, %s599_s23), 15  ;;  %v320_v4 = vld [vmem:[%s851_s4 + $0x3] sm:$0x1]  ;;  %v341_v5 = vmul.f32 %v318_v3, %v313_v0  ;;  %v691_v8 = vld [vmem:[%s851_s4] ss:$0 sm:$0xff] }
   0xd   : > { %v343_v6 = vshrl.u32 %v342_v1, 7  ;;  %v386_v7 = vmul.f32 %v320_v4, %v315_v2  ;;  %s686_s8 = sshll.u32 %s855_s23, 3  ;;  %v696_v9 = vld [vmem:[%s851_s4 + $0x2] ss:$0 sm:$0xff]  ;;  %v713_v12 = vld [vmem:[%s850_s3 + $0x6] ss:$0 sm:$0xff] }
   0xe   : > { %s702_s15 = scalar_lea.vmem %s847_s0, %s686_s8  ;;  %s708_s18 = scalar_lea.vmem %s848_s1, %s686_s8  ;;  %v731_v24 = vld [vmem:[%s850_s3 + $0x8] ss:$0 sm:$0xff] }
   0xf   : > { %v344_v10 = vsub.s32 0, %v343_v6  ;;  %v419_v11 = vmul.f32 %v386_v7, %v386_v7  ;;  %v321_v13 = vld [vmem:[%s702_s15] sm:$0xff]  ;;  %v322_v17 = vld [vmem:[%s702_s15 + $0x8] sm:$0xff]  ;;  %v323_v22 = vld [vmem:[%s702_s15 + $0x10] sm:$0xff]  ;;  %s767_s26 = scalar_lea.vmem %s852_s5, %s686_s8  ;;  %s778_s29 = scalar_lea.vmem %s849_s2, %s686_s8 }
  0x10   : > { %v366_v15 = vld [vmem:[%s708_s18] sm:$0xff]  ;;  %v333_v18 = vsub.f32 %v321_v13, %v691_v8  ;;  %v334_v20 = vsub.f32 %v322_v17, %v691_v8  ;;  %v367_v21 = vld [vmem:[%s708_s18 + $0x8] sm:$0xff]  ;;  %v368_v23 = vld [vmem:[%s708_s18 + $0x10] sm:$0xff]  ;;  %v335_v26 = vsub.f32 %v323_v22, %v691_v8  ;;  %s810_s9 = scalar_lea.vmem %s853_s6, %s686_s8 }
  0x11   : > { %v716_v14 = vrot.slane %v341_v5, %v344_v10  ;;  %v719_v16 = vrot.slane %v386_v7, %v344_v10  ;;  %v378_v19 = vsub.f32 %v366_v15, %v696_v9  ;;  %v379_v25 = vsub.f32 %v367_v21, %v696_v9  ;;  %v324_v28 = vld [vmem:[%s702_s15 + $0x18] sm:$0xff]  ;;  %v325_v39 = vld [vmem:[%s702_s15 + $0x20] sm:$0xff]  ;;  %v326_v45 = vld [vmem:[%s702_s15 + $0x28] sm:$0xff] }
  0x12   : > { %v380_v27 = vsub.f32 %v368_v23, %v696_v9  ;;  %v369_v29 = vld [vmem:[%s708_s18 + $0x18] sm:$0xff]  ;;  %v738_v30 = vrot.slane %v419_v11, %v344_v10  ;;  %v336_v34 = vsub.f32 %v324_v28, %v691_v8  ;;  %v370_v40 = vld [vmem:[%s708_s18 + $0x20] sm:$0xff]  ;;  %v371_v50 = vld [vmem:[%s708_s18 + $0x28] sm:$0xff]  ;;  %v337_v53 = vsub.f32 %v325_v39, %v691_v8 }
  0x13   : > { %v346_v31 = vmul.f32 %v716_v14, %v333_v18  ;;  %v391_v32 = vmul.f32 %v719_v16, %v378_v19  ;;  %v347_v33 = vmul.f32 %v716_v14, %v334_v20  ;;  %v392_v35 = vmul.f32 %v719_v16, %v379_v25  ;;  %v327_v59 = vld [vmem:[%s702_s15 + $0x30] sm:$0xff]  ;;  %v328_v1 = vld [vmem:[%s702_s15 + $0x38] sm:$0xff]  ;;  %v411_v15 = vld [vmem:[%s778_s29] sm:$0xff] }
  0x14   : > { %v348_v36 = vmul.f32 %v716_v14, %v335_v26  ;;  %v393_v37 = vmul.f32 %v719_v16, %v380_v27  ;;  %v381_v38 = vsub.f32 %v369_v29, %v696_v9  ;;  %v349_v44 = vmul.f32 %v716_v14, %v336_v34  ;;  %v372_v0 = vld [vmem:[%s708_s18 + $0x30] sm:$0xff]  ;;  %v373_v6 = vld [vmem:[%s708_s18 + $0x38] sm:$0xff]  ;;  %v412_v26 = vld [vmem:[%s778_s29 + $0x8] sm:$0xff] }
  0x15   : > { %v358_v41 = vadd.f32 %v713_v12, %v346_v31  ;;  %v403_v42 = vadd.f32 %v731_v24, %v391_v32  ;;  %v359_v43 = vadd.f32 %v713_v12, %v347_v33  ;;  %v404_v46 = vadd.f32 %v731_v24, %v392_v35  ;;  %v413_v29 = vld [vmem:[%s778_s29 + $0x10] sm:$0xff]  ;;  %v414_v34 = vld [vmem:[%s778_s29 + $0x18] sm:$0xff] }
  0x16   : > { %v360_v47 = vadd.f32 %v713_v12, %v348_v36  ;;  %v405_v48 = vadd.f32 %v731_v24, %v393_v37  ;;  %v394_v49 = vmul.f32 %v719_v16, %v381_v38  ;;  %v361_v52 = vadd.f32 %v713_v12, %v349_v44  ;;  %v415_v38 = vld [vmem:[%s778_s29 + $0x20] sm:$0xff]  ;;  %v417_v44 = vld [vmem:[%s778_s29 + $0x30] sm:$0xff] }
  0x17   : > { %v432_v51 = vadd.f32 %v403_v42, %v358_v41  ;;  %v382_v54 = vsub.f32 %v370_v40, %v696_v9  ;;  %v433_v55 = vadd.f32 %v404_v46, %v359_v43  ;;  %v338_v58 = vsub.f32 %v326_v45, %v691_v8  ;;  %v416_v41 = vld [vmem:[%s778_s29 + $0x28] sm:$0xff] }
  0x18   : > { %v769_v56 = vadd.f32 %v405_v48, %v360_v47  ;;  %v406_v57 = vadd.f32 %v731_v24, %v394_v49  ;;  %v350_v61 = vmul.f32 %v716_v14, %v337_v53  ;;  %v383_v63 = vsub.f32 %v371_v50, %v696_v9  ;;  %v418_v47 = vld [vmem:[%s778_s29 + $0x38] sm:$0xff] }
  0x19   : > { %v440_v60 = vmax.f32 %v432_v51, 0.0  ;;  %v395_v62 = vmul.f32 %v719_v16, %v382_v54  ;;  %v441_v2 = vmax.f32 %v433_v55, 0.0  ;;  %v351_v5 = vmul.f32 %v716_v14, %v338_v58 }
  0x1a   : > { %v442_v3 = vmax.f32 %v769_v56, 0.0  ;;  %v435_v4 = vadd.f32 %v406_v57, %v361_v52  ;;  %v362_v7 = vadd.f32 %v713_v12, %v350_v61  ;;  %v396_v11 = vmul.f32 %v719_v16, %v383_v63 }
  0x1b   : > { %448 = vst [vmem:[%s767_s26] sm:$0xff] %v440_v60  ;;  %v407_v10 = vadd.f32 %v731_v24, %v395_v62  ;;  %v339_v13 = vsub.f32 %v327_v59, %v691_v8  ;;  %449 = vst [vmem:[%s767_s26 + $0x8] sm:$0xff] %v441_v2  ;;  %v363_v18 = vadd.f32 %v713_v12, %v351_v5  ;;  %vm456_vm0 = vcmp.gt.f32.partialorder %v432_v51, 0.0 }
  0x1c   : > { %450 = vst [vmem:[%s767_s26 + $0x10] sm:$0xff] %v442_v3  ;;  %v443_v17 = vmax.f32 %v435_v4, 0.0  ;;  %v384_v19 = vsub.f32 %v372_v0, %v696_v9  ;;  %v340_v20 = vsub.f32 %v328_v1, %v691_v8  ;;  %v408_v22 = vadd.f32 %v731_v24, %v396_v11 }
  0x1d   : > { %v436_v21 = vadd.f32 %v407_v10, %v362_v7  ;;  %v352_v23 = vmul.f32 %v716_v14, %v339_v13  ;;  %v385_v25 = vsub.f32 %v373_v6, %v696_v9  ;;  %v424_v8 = vmul.f32 %v738_v30, %v411_v15 }
  0x1e   : > { %451 = vst [vmem:[%s767_s26 + $0x18] sm:$0xff] %v443_v17  ;;  %v397_v27 = vmul.f32 %v719_v16, %v384_v19  ;;  %v353_v28 = vmul.f32 %v716_v14, %v340_v20  ;;  %v437_v9 = vadd.f32 %v408_v22, %v363_v18  ;;  %v425_v37 = vmul.f32 %v738_v30, %v412_v26 }
  0x1f   : > { %v444_v31 = vmax.f32 %v436_v21, 0.0  ;;  %v364_v32 = vadd.f32 %v713_v12, %v352_v23  ;;  %v398_v33 = vmul.f32 %v719_v16, %v385_v25  ;;  %v464_v36 = vsel %vm456_vm0, %v424_v8, 0.0 }
  0x20   : > { %v409_v14 = vadd.f32 %v731_v24, %v397_v27  ;;  %v365_v35 = vadd.f32 %v713_v12, %v353_v28  ;;  %v445_v39 = vmax.f32 %v437_v9, 0.0  ;;  %472 = vst [vmem:[%s810_s9] sm:$0xff] %v464_v36  ;;  %vm457_vm1 = vcmp.gt.f32.partialorder %v433_v55, 0.0 }
  0x21   : > { %452 = vst [vmem:[%s767_s26 + $0x20] sm:$0xff] %v444_v31  ;;  %v410_v40 = vadd.f32 %v731_v24, %v398_v33  ;;  %v426_v16 = vmul.f32 %v738_v30, %v413_v29  ;;  %v465_v43 = vsel %vm457_vm1, %v425_v37, 0.0  ;;  %vm458_vm2 = vcmp.gt.f32.partialorder %v769_v56, 0.0 }
  0x22   : > { %v438_v42 = vadd.f32 %v409_v14, %v364_v32  ;;  %v427_v12 = vmul.f32 %v738_v30, %v414_v34  ;;  %453 = vst [vmem:[%s767_s26 + $0x28] sm:$0xff] %v445_v39  ;;  %473 = vst [vmem:[%s810_s9 + $0x8] sm:$0xff] %v465_v43  ;;  %vm459_vm3 = vcmp.gt.f32.partialorder %v435_v4, 0.0  ;;  %v428_v46 = vmul.f32 %v738_v30, %v415_v38 }
  0x23   : > { %v439_v45 = vadd.f32 %v410_v40, %v365_v35  ;;  %v466_v24 = vsel %vm458_vm2, %v426_v16, 0.0  ;;  %vm460_vm4 = vcmp.gt.f32.partialorder %v436_v21, 0.0  ;;  %v429_v50 = vmul.f32 %v738_v30, %v416_v41 }
  0x24   : > { %v446_v48 = vmax.f32 %v438_v42, 0.0  ;;  %474 = vst [vmem:[%s810_s9 + $0x10] sm:$0xff] %v466_v24  ;;  %v467_v49 = vsel %vm459_vm3, %v427_v12, 0.0  ;;  %v468_v52 = vsel %vm460_vm4, %v428_v46, 0.0  ;;  %vm461_vm5 = vcmp.gt.f32.partialorder %v437_v9, 0.0 }
  0x25   : > { %v447_v51 = vmax.f32 %v439_v45, 0.0  ;;  %475 = vst [vmem:[%s810_s9 + $0x18] sm:$0xff] %v467_v49  ;;  %v430_v53 = vmul.f32 %v738_v30, %v417_v44  ;;  %476 = vst [vmem:[%s810_s9 + $0x20] sm:$0xff] %v468_v52  ;;  %v469_v54 = vsel %vm461_vm5, %v429_v50, 0.0  ;;  %vm462_vm6 = vcmp.gt.f32.partialorder %v438_v42, 0.0 }
  0x26   : > { %454 = vst [vmem:[%s767_s26 + $0x30] sm:$0xff] %v446_v48  ;;  %v431_v55 = vmul.f32 %v738_v30, %v418_v47  ;;  %vm463_vm7 = vcmp.gt.f32.partialorder %v439_v45, 0.0  ;;  %477 = vst [vmem:[%s810_s9 + $0x28] sm:$0xff] %v469_v54 }
  0x27   : > { %455 = vst [vmem:[%s767_s26 + $0x38] sm:$0xff] %v447_v51  ;;  %v470_v56 = vsel %vm462_vm6, %v430_v53, 0.0 }
  0x28   : > { %478 = vst [vmem:[%s810_s9 + $0x30] sm:$0xff] %v470_v56  ;;  %v471_v57 = vsel %vm463_vm7, %v431_v55, 0.0 }
  0x29   : > { %479 = vst [vmem:[%s810_s9 + $0x38] sm:$0xff] %v471_v57 }
  0x2a PF: > { %s17_s21 = sadd.s32 1, %s629_s21  }
  0x2b   : > { %p14_p4 = scmp.ge.s32.totalorder %s17_s21, 4  }
  0x2d   :  { %16 = sbr.rel (!%p14_p4) target bundleno = 1 (0x1), region = 88 }

// kernel: block_forward.4
= control target key start
LH: loop header
LB: loop body
LE: loop exit
PB: predicated region body
PF: predicated region fallthrough
CT: control target
= control target key end

     0   :  { %s707_s18 = smov 0   ;;  %s778_s0 = inlined_call_operand.vmem [shape: f32[128,128], index: 0, kind: input, shape index: {}]   ;;  %s779_s1 = inlined_call_operand.vmem [shape: bf16[128,128], index: 1, kind: input, shape index: {}]   ;;  %s780_s2 = inlined_call_operand.vmem [shape: f32[16,128], index: 2, kind: input, shape index: {}]   ;;  %s781_s3 = inlined_call_operand.vmem [shape: f32[8,128], index: 3, kind: input, shape index: {}]   ;;  %s782_s4 = inlined_call_operand.vmem [shape: f32[128,128], index: 4, kind: output, shape index: {0}]   ;;  %s783_s5 = inlined_call_operand.vmem [shape: f32[2,8,128], index: 5, kind: output, shape index: {1}]  }
   0x1 LB: > { %s713_s19 = sadd.s32 4294967295, %s675_s18   ;;  %p582_p0 = scmp.ge.s32.totalorder %s675_s18, 1  ;;  %s675_s18 = sphi %s707_s18, %s16_s18  }
   0x2   : > { %p191_p1 = scmp.lt.s32.totalorder %s675_s18, 3 }
   0x4   : > { %p192_p2 = pnand %p582_p0, %p191_p1 }
   0x5   : > { %s583_s22 = sshll.u32 (!%p192_p2), %s713_s19, 3  ;;  %p235_p4 = scmp.lt.s32.totalorder (!%p192_p2), %s713_s19, 1 }
   0x6   : > { %195 = sbr.rel (%p192_p2) target bundleno = 306 (0x132), region = 36  ;;  %p224_p3 = scmp.lt.s32.totalorder (!%p192_p2), %s583_s22, 15 }
   0xb   : > { %v661_v0 = vld [vmem:[%s779_s1 + $0x38] sm:$0xff]   ;;  %v264_v1 = vlaneseq  ;;  %v662_v2 = vld [vmem:[%s779_s1 + $0x30] sm:$0xff]   ;;  %s785_s22 = smov (!%p224_p3, %s583_s22), 15  ;;  %v663_v3 = vld [vmem:[%s779_s1 + $0x28] sm:$0xff]   ;;  %s787_s19 = smov (!%p235_p4, %s713_s19), 1  ;;  %vm486_vm0 = vcmask 1040384  }
   0xc   : > { %613 = vmatprep.subr.bf16.mxu0 %v661_v0  ;;  %637 = vmatprep.subr.bf16.mxu1 %v661_v0  ;;  %s584_s27 = sshll.u32 %s785_s22, 3  ;;  %v664_v5 = vld [vmem:[%s779_s1 + $0x20] sm:$0xff]   ;;  %v665_v22 = vld [vmem:[%s779_s1 + $0x18] sm:$0xff]   ;;  %v666_v34 = vld [vmem:[%s779_s1 + $0x10] sm:$0xff]   ;;  %s587_s22 = sshll.u32 %s787_s19, 3  ;;  %vm488_vm1 = vcmask 1041408  }
   0xd   : > { %614 = vmatpush3.bf16.msra.mxu0 %v661_v0  ;;  %645 = vmatpush3.bf16.msra.mxu1 %v661_v0  ;;  %v265_v4 = vshrl.u32 %v264_v1, 7  ;;  %s227_s30 = scalar_lea.vmem %s778_s0, %s584_s27  ;;  %v588_v8 = vld [vmem:[%s781_s3] ss:$0 sm:$0xff]  ;;  %v261_v10 = vld [vmem:[%s781_s3 + $0x1] sm:$0x1]  ;;  %v667_v47 = vld [vmem:[%s779_s1 + $0x8] sm:$0xff]   ;;  %s233_s7 = scalar_lea.vmem %s782_s4, %s584_s27 }
   0xe   : > { %615 = vmatprep.subr.bf16.mxu0 %v662_v2  ;;  %638 = vmatprep.subr.bf16.mxu1 %v662_v2  ;;  %v240_v6 = vld [vmem:[%s227_s30] sm:$0xff]  ;;  %v241_v7 = vld [vmem:[%s227_s30 + $0x8] sm:$0xff]  ;;  %v242_v15 = vld [vmem:[%s227_s30 + $0x10] sm:$0xff]  ;;  %s238_s9 = scalar_lea.vmem %s783_s5, %s587_s22 }
   0xf   : > { %v266_v9 = vsub.s32 0, %v265_v4  ;;  %v262_v11 = vld [vmem:[%s780_s2 + $0x3] sm:$0x1]  ;;  %v253_v12 = vsub.f32 %v240_v6, %v588_v8  ;;  %v254_v13 = vsub.f32 %v241_v7, %v588_v8  ;;  %v243_v16 = vld [vmem:[%s227_s30 + $0x18] sm:$0xff]  ;;  %v245_v18 = vld [vmem:[%s227_s30 + $0x28] sm:$0xff]  ;;  %v255_v26 = vsub.f32 %v242_v15, %v588_v8 }
  0x10   : > { %v263_v14 = vmul.f32 %v262_v11, %v261_v10  ;;  %v244_v17 = vld [vmem:[%s227_s30 + $0x20] sm:$0xff]  ;;  %v246_v20 = vld [vmem:[%s227_s30 + $0x30] sm:$0xff]  ;;  %v247_v21 = vld [vmem:[%s227_s30 + $0x38] sm:$0xff]  ;;  %v258_v24 = vsub.f32 %v245_v18, %v588_v8  ;;  %v256_v27 = vsub.f32 %v243_v16, %v588_v8 }
  0x11   : > { %616 = vmatpush3.bf16.msra.mxu0 %v662_v2  ;;  %646 = vmatpush3.bf16.msra.mxu1 %v662_v2  ;;  %v257_v19 = vsub.f32 %v244_v17, %v588_v8  ;;  %v589_v25 = vld [vmem:[%s780_s2 + $0x4] ss:$0 sm:$0xff]  ;;  %v259_v30 = vsub.f32 %v246_v20, %v588_v8  ;;  %v260_v31 = vsub.f32 %v247_v21, %v588_v8  ;;  %v590_v61 = vld [vmem:[%s780_s2 + $0x1] ss:$0 sm:$0xff] }
  0x12   : > { %617 = vmatprep.subr.bf16.mxu0 %v663_v3  ;;  %639 = vmatprep.subr.bf16.mxu1 %v663_v3  ;;  %v267_v23 = vrot.slane %v263_v14, %v266_v9  ;;  %v668_v54 = vld [vmem:[%s779_s1] sm:$0xff]  }
  0x14   : > { %v268_v28 = vmul.f32 %v267_v23, %v253_v12  ;;  %v269_v29 = vmul.f32 %v267_v23, %v254_v13  ;;  %v272_v32 = vmul.f32 %v267_v23, %v257_v19  ;;  %v273_v33 = vmul.f32 %v267_v23, %v258_v24 }
  0x15   : > { %618 = vmatpush3.bf16.msra.mxu0 %v663_v3  ;;  %647 = vmatpush3.bf16.msra.mxu1 %v663_v3  ;;  %v270_v37 = vmul.f32 %v267_v23, %v255_v26  ;;  %v271_v38 = vmul.f32 %v267_v23, %v256_v27  ;;  %v274_v43 = vmul.f32 %v267_v23, %v259_v30 }
  0x16   : > { %619 = vmatprep.subr.bf16.mxu0 %v664_v5  ;;  %640 = vmatprep.subr.bf16.mxu1 %v664_v5  ;;  %v281_v35 = vadd.f32 %v589_v25, %v268_v28  ;;  %v282_v36 = vadd.f32 %v589_v25, %v269_v29  ;;  %v285_v39 = vadd.f32 %v589_v25, %v272_v32 }
  0x17   : > { %v286_v40 = vadd.f32 %v589_v25, %v273_v33  ;;  %v275_v44 = vmul.f32 %v267_v23, %v260_v31  ;;  %v283_v50 = vadd.f32 %v589_v25, %v270_v37  ;;  %v284_v51 = vadd.f32 %v589_v25, %v271_v38 }
  0x18   : > { %v289_v41 = vmax.f32 %v281_v35, 0.0  ;;  %v290_v42 = vmax.f32 %v282_v36, 0.0  ;;  %v293_v45 = vmax.f32 %v285_v39, 0.0  ;;  %v287_v52 = vadd.f32 %v589_v25, %v274_v43 }
  0x19   : > { %620 = vmatpush3.bf16.msra.mxu0 %v664_v5  ;;  %648 = vmatpush3.bf16.msra.mxu1 %v664_v5  ;;  %v294_v46 = vmax.f32 %v286_v40, 0.0  ;;  %v288_v53 = vadd.f32 %v589_v25, %v275_v44  ;;  %v291_v55 = vmax.f32 %v283_v50, 0.0  ;;  %v292_v56 = vmax.f32 %v284_v51, 0.0 }
  0x1a   : > { %621 = vmatprep.subr.bf16.mxu0 %v665_v22  ;;  %641 = vmatprep.subr.bf16.mxu1 %v665_v22  ;;  %v297_v48 = vpack.c.bf16 %v290_v42, %v289_v41  ;;  %v295_v57 = vmax.f32 %v287_v52, 0.0 }
  0x1b   : > { %v299_v49 = vpack.c.bf16 %v294_v46, %v293_v45  ;;  %v296_v58 = vmax.f32 %v288_v53, 0.0  ;;  %v298_v59 = vpack.c.bf16 %v292_v56, %v291_v55 }
  0x1c   : > { %629 = vmatprep.mubr.bf16.mxu0 %v297_v48 }
  0x1d   : > { %622 = vmatpush3.bf16.msra.mxu0 %v665_v22  ;;  %649 = vmatpush3.bf16.msra.mxu1 %v665_v22  ;;  %v300_v60 = vpack.c.bf16 %v296_v58, %v295_v57 }
  0x1e   : > { %623 = vmatprep.subr.bf16.mxu0 %v666_v34  ;;  %642 = vmatprep.subr.bf16.mxu1 %v666_v34 }
  0x1f   : > { %633 = vmatprep.mubr.bf16.mxu1 %v299_v49 }
  0x21   : > { %624 = vmatpush3.bf16.msra.mxu0 %v666_v34  ;;  %650 = vmatpush3.bf16.msra.mxu1 %v666_v34 }
  0x22   : > { %625 = vmatprep.subr.bf16.mxu0 %v667_v47  ;;  %643 = vmatprep.subr.bf16.mxu1 %v667_v47 }
  0x25   : > { %626 = vmatpush3.bf16.msra.mxu0 %v667_v47  ;;  %651 = vmatpush3.bf16.msra.mxu1 %v667_v47 }
  0x26   : > { %627 = vmatprep.subr.bf16.mxu0 %v668_v54  ;;  %644 = vmatprep.subr.bf16.mxu1 %v668_v54 }
  0x29   : > { %628 = vmatpush3.bf16.msra.mxu0 %v668_v54  ;;  %652 = vmatpush3.bf16.msra.mxu1 %v668_v54 }
  0x2c   : > { %630 = vmatmul.mubr.bf16.vlgmr.msra.gmra.mxu0 %v298_v59  ;;  %634 = vmatmul.mubr.bf16.vlgmr.msra.gmra.mxu1 %v300_v60 }
  0xec   : > { %v631_v62 = vpop.f32.mrf.mxu0  ;;  %v635_v63 = vpop.f32.mrf.mxu1 }
  0xed   : > { %v413_v0 = vadd.f32 %v631_v62, %v590_v61  ;;  %v429_v1 = vadd.f32 %v635_v63, %v590_v61 }
  0xee   : > { %v404_v2 = vpop.f32.mrf.mxu0  ;;  %v420_v3 = vpop.f32.mrf.mxu1 }
  0xef   : > { %437 = vst [vmem:[%s233_s7 + $0x10] sm:$0xff] %v413_v0  ;;  %v405_v4 = vadd.f32 %v590_v61, %v404_v2  ;;  %441 = vst [vmem:[%s233_s7 + $0x30] sm:$0xff] %v429_v1  ;;  %v421_v5 = vadd.f32 %v590_v61, %v420_v3 }
  0xf0   : > { %v632_v6 = vpop.f32.mrf.mxu0  ;;  %v636_v7 = vpop.f32.mrf.mxu1 }
  0xf1   : > { %435 = vst [vmem:[%s233_s7] sm:$0xff] %v405_v4  ;;  %v416_v8 = vadd.f32 %v632_v6, %v590_v61  ;;  %439 = vst [vmem:[%s233_s7 + $0x20] sm:$0xff] %v421_v5  ;;  %v432_v9 = vadd.f32 %v636_v7, %v590_v61 }
  0xf2   : > { %v407_v10 = vpop.f32.mrf.mxu0  ;;  %v423_v11 = vpop.f32.mrf.mxu1 }
  0xf3   : > { %438 = vst [vmem:[%s233_s7 + $0x18] sm:$0xff] %v416_v8  ;;  %v408_v12 = vadd.f32 %v590_v61, %v407_v10  ;;  %442 = vst [vmem:[%s233_s7 + $0x38] sm:$0xff] %v432_v9  ;;  %v424_v13 = vadd.f32 %v590_v61, %v423_v11 }
  0xf5   : > { %436 = vst [vmem:[%s233_s7 + $0x8] sm:$0xff] %v408_v12  ;;  %v443_v14 = vadd.f32 %v408_v12, %v405_v4  ;;  %440 = vst [vmem:[%s233_s7 + $0x28] sm:$0xff] %v424_v13 }
  0xf7   : > { %v444_v15 = vadd.f32 %v443_v14, %v413_v0 }
  0xf9   : > { %v445_v16 = vadd.f32 %v444_v15, %v416_v8 }
  0xfb   : > { %v446_v17 = vadd.f32 %v445_v16, %v421_v5 }
  0xfd   : > { %v447_v18 = vadd.f32 %v446_v17, %v424_v13 }
  0xff   : > { %v448_v19 = vadd.f32 %v447_v18, %v429_v1 }
 0x101   : > { %v449_v20 = vadd.f32 %v448_v19, %v432_v9 }
 0x103   : > { %v450_v21 = vrot.slane %v449_v20, 4 }
 0x105   : > { %v451_v22 = vadd.f32 %v450_v21, %v449_v20 }
 0x107   : > { %v452_v23 = vrot.slane %v451_v22, 2 }
 0x109   : > { %v453_v24 = vadd.f32 %v452_v23, %v451_v22 }
 0x10b   : > { %v454_v25 = vrot.slane %v453_v24, 1 }
 0x10d   : > { %v455_v26 = vadd.f32 %v454_v25, %v453_v24 }
 0x10f   : > { %v456_v27 = vmul.f32 0.015625, %v455_v26 }
 0x111   : > { %v457_v28 = vsub.f32 %v405_v4, %v456_v27  ;;  %v458_v29 = vsub.f32 %v408_v12, %v456_v27  ;;  %v459_v30 = vsub.f32 %v413_v0, %v456_v27  ;;  %v460_v31 = vsub.f32 %v416_v8, %v456_v27 }
 0x112   : > { %v461_v34 = vsub.f32 %v421_v5, %v456_v27  ;;  %v462_v37 = vsub.f32 %v424_v13, %v456_v27  ;;  %v463_v40 = vsub.f32 %v429_v1, %v456_v27  ;;  %v464_v43 = vsub.f32 %v432_v9, %v456_v27 }
 0x113   : > { %v465_v32 = vmul.f32 %v457_v28, %v457_v28  ;;  %v466_v33 = vmul.f32 %v458_v29, %v458_v29  ;;  %v467_v35 = vmul.f32 %v459_v30, %v459_v30  ;;  %v468_v38 = vmul.f32 %v460_v31, %v460_v31 }
 0x114   : > { %v469_v41 = vmul.f32 %v461_v34, %v461_v34  ;;  %v470_v44 = vmul.f32 %v462_v37, %v462_v37  ;;  %v471_v46 = vmul.f32 %v463_v40, %v463_v40  ;;  %v472_v48 = vmul.f32 %v464_v43, %v464_v43 }
 0x115   : > { %v473_v36 = vadd.f32 %v466_v33, %v465_v32 }
 0x117   : > { %v474_v39 = vadd.f32 %v473_v36, %v467_v35 }
 0x119   : > { %v475_v42 = vadd.f32 %v474_v39, %v468_v38 }
 0x11b   : > { %v476_v45 = vadd.f32 %v475_v42, %v469_v41 }
 0x11d   : > { %v477_v47 = vadd.f32 %v476_v45, %v470_v44 }
 0x11f   : > { %v478_v49 = vadd.f32 %v477_v47, %v471_v46 }
 0x121   : > { %v479_v50 = vadd.f32 %v478_v49, %v472_v48 }
 0x123   : > { %v480_v51 = vrot.slane %v479_v50, 4 }
 0x125   : > { %v481_v52 = vadd.f32 %v480_v51, %v479_v50 }
 0x127   : > { %v482_v53 = vrot.slane %v481_v52, 2 }
 0x129   : > { %v483_v54 = vadd.f32 %v482_v53, %v481_v52 }
 0x12b   : > { %v484_v55 = vrot.slane %v483_v54, 1 }
 0x12d   : > { %v485_v56 = vadd.f32 %v484_v55, %v483_v54 }
 0x12f   : > { %v487_v57 = vsel %vm486_vm0, %v456_v27, %v485_v56 }
 0x130   : > { %v489_v58 = vsel %vm488_vm1, %v487_v57, 0.0 }
 0x131   : > { %490 = vst [vmem:[%s238_s9] sm:$0xff] %v489_v58 }
 0x132 PF: > { %s16_s18 = sadd.s32 1, %s675_s18  }
 0x133   : > { %p13_p5 = scmp.ge.s32.totalorder %s16_s18, 4  }
 0x135   :  { %15 = sbr.rel (!%p13_p5) target bundleno = 1 (0x1), region = 78 }

// kernel: block_forward.3
= control target key start
LH: loop header
LB: loop body
LE: loop exit
PB: predicated region body
PF: predicated region fallthrough
CT: control target
= control target key end

     0   :  { %s2415_s30 = smov 0   ;;  %s2804_s0 = inlined_call_operand.vmem [shape: bf16[2,9,9,128], index: 0, kind: input, shape index: {}]   ;;  %s2805_s1 = inlined_call_operand.vmem [shape: bf16[2,8,8,128], index: 1, kind: input, shape index: {}]   ;;  %s2806_s2 = inlined_call_operand.vmem [shape: bf16[2,8,8,128], index: 2, kind: input, shape index: {}]   ;;  %s2807_s3 = inlined_call_operand.vmem [shape: bf16[4,128,128], index: 3, kind: input, shape index: {}]   ;;  %s2808_s4 = inlined_call_operand.vmem [shape: bf16[128,128], index: 4, kind: input, shape index: {}]   ;;  %s2809_s5 = inlined_call_operand.vmem [shape: f32[16,128], index: 5, kind: input, shape index: {}]   ;;  %s2810_s6 = inlined_call_operand.vmem [shape: f32[128,128], index: 6, kind: output, shape index: {0}]   ;;  %s2811_s7 = inlined_call_operand.vmem [shape: f32[128,128], index: 7, kind: output, shape index: {1}]   ;;  %s2812_s8 = inlined_call_operand.vmem [shape: f32[128,128], index: 8, kind: output, shape index: {2}]   ;;  %s2813_s9 = inlined_call_operand.vmem [shape: f32[2,8,128], index: 9, kind: output, shape index: {3}]  }
   0x1 LB: > { %s2421_s10 = sadd.s32 4294967295, %s2363_s30   ;;  %p1913_p0 = scmp.ge.s32.totalorder %s2363_s30, 1  ;;  %s2363_s30 = sphi %s2415_s30, %s20_s30  }
   0x2   : > { %p314_p1 = scmp.lt.s32.totalorder %s2363_s30, 3 }
   0x4   : > { %p315_p2 = pnand %p1913_p0, %p314_p1 }
   0x5   : > { %p374_p3 = scmp.lt.s32.totalorder (!%p315_p2), %s2421_s10, 1  ;;  %s1919_s14 = sshll.u32 (!%p315_p2), %s2421_s10, 3 }
   0x6   : > { %318 = sbr.rel (%p315_p2) target bundleno = 371 (0x173), region = 44  ;;  %p390_p4 = scmp.lt.s32.totalorder (!%p315_p2), %s1919_s14, 15 }
   0xb   : > { %v2293_v0 = vld [vmem:[%s2807_s3 + $0x78] sm:$0xff]   ;;  %v2295_v2 = vld [vmem:[%s2807_s3 + $0x70] sm:$0xff]   ;;  %v2297_v4 = vld [vmem:[%s2807_s3 + $0x68] sm:$0xff]   ;;  %s2445_s23 = scalar_select %p374_p3, %s2421_s10, 1  ;;  %vm444_vm0 = vsmask.f32 3328 }
   0xc   : > { %v2294_v1 = vld [vmem:[%s2807_s3 + $0x38] sm:$0xff]   ;;  %2140 = vmatprep.subr.bf16.mxu0 %v2293_v0  ;;  %v2296_v3 = vld [vmem:[%s2807_s3 + $0x30] sm:$0xff]   ;;  %v2298_v5 = vld [vmem:[%s2807_s3 + $0x28] sm:$0xff]   ;;  %vm445_vm1 = vsmask.f32 7440  ;;  %s2817_s14 = smov (!%p390_p4, %s1919_s14), 15 }
   0xd   : > { %2164 = vmatprep.subr.bf16.mxu1 %v2294_v1  ;;  %2141 = vmatpush3.bf16.msra.mxu0 %v2293_v0  ;;  %v2299_v6 = vld [vmem:[%s2807_s3 + $0x60] sm:$0xff]   ;;  %s2284_s28 = smul.u32 72, %s2445_s23  ;;  %v2301_v8 = vld [vmem:[%s2807_s3 + $0x58] sm:$0xff]   ;;  %v2303_v10 = vld [vmem:[%s2807_s3 + $0x50] sm:$0xff]   ;;  %s2066_s13 = sshll.u32 %s2445_s23, 5  ;;  %vm1721_vm3 = vcmask 1040384  }
   0xe   : > { %2165 = vmatpush3.bf16.msra.mxu1 %v2294_v1  ;;  %2142 = vmatprep.subr.bf16.mxu0 %v2295_v2  ;;  %v2300_v7 = vld [vmem:[%s2807_s3 + $0x20] sm:$0xff]   ;;  %v2302_v9 = vld [vmem:[%s2807_s3 + $0x18] sm:$0xff]   ;;  %v2304_v11 = vld [vmem:[%s2807_s3 + $0x10] sm:$0xff]   ;;  %s2624_s17 = scalar_lea.vmem %s2805_s1, %s2066_s13  ;;  %s2640_s22 = scalar_lea.vmem %s2806_s2, %s2066_s13  ;;  %vm1723_vm4 = vcmask 1041408   ;;  %vm1725_vm5 = vcmask 1042432   ;;  %vm1727_vm6 = vcmask 1043456  }
   0xf   : > { %2166 = vmatprep.subr.bf16.mxu1 %v2296_v3  ;;  %s2463_s16 = scalar_lea.vmem %s2804_s0, %s2284_s28  ;;  %v2305_v17 = vld [vmem:[%s2807_s3 + $0x48] sm:$0xff]   ;;  %v2307_v41 = vld [vmem:[%s2807_s3 + $0x40] sm:$0xff]   ;;  %vm2498_vm2 = vmor %vm444_vm0, %vm445_vm1  ;;  %s2681_s15 = sshll.u32 %s2817_s14, 3 }
  0x10   : > { %v412_v12 = vld [vmem:[%s2463_s16] sm:$0xf]  ;;  %v413_v13 = vld [vmem:[%s2463_s16 + $0x8] sm:$0xf]  ;;  %v436_v14 = vld [vmem:[%s2463_s16 + $0x4] sm:$0x1]  ;;  %s2690_s20 = scalar_lea.vmem %s2810_s6, %s2681_s15  ;;  %s2756_s28 = scalar_lea.vmem %s2812_s8, %s2681_s15 }
  0x11   : > { %2143 = vmatpush3.bf16.msra.mxu0 %v2295_v2  ;;  %v437_v15 = vld [vmem:[%s2463_s16 + $0xc] sm:$0x1]  ;;  %v1954_v16 = vcombine.low %v412_v12, %v413_v13  ;;  %v448_v18 = vshrl.u32 %v412_v12, 16  ;;  %v451_v19 = vshll.u32 %v412_v12, 16  ;;  %v457_v20 = vshll.u32 %v436_v14, 16  ;;  %v2308_v47 = vld [vmem:[%s2807_s3] sm:$0xff]  }
  0x12   : > { %2167 = vmatpush3.bf16.msra.mxu1 %v2296_v3  ;;  %2144 = vmatprep.subr.bf16.mxu0 %v2297_v4  ;;  %v462_v21 = vshrl.u32 %v413_v13, 16  ;;  %v2479_v22 = vld [vmem:[%s2463_s16 + $0x10] sm:$0xf]  ;;  %v2306_v23 = vld [vmem:[%s2807_s3 + $0x8] sm:$0xff]   ;;  %v465_v24 = vshll.u32 %v413_v13, 16  ;;  %v471_v25 = vshll.u32 %v437_v15, 16 }
  0x13   : > { %2168 = vmatprep.subr.bf16.mxu1 %v2298_v5  ;;  %2180 = vmatprep.mubr.bf16.mxu1 %v1954_v16  ;;  %v2485_v26 = vld [vmem:[%s2463_s16 + $0x18] sm:$0xf]  ;;  %v438_v27 = vld [vmem:[%s2463_s16 + $0x14] sm:$0x1]  ;;  %v450_v28 = vrot.slane %v448_v18, 4  ;;  %v453_v29 = vrot.slane %v451_v19, 5 }
  0x14   : > { %v459_v30 = vrot.slane %v457_v20, 5  ;;  %v464_v31 = vrot.slane %v462_v21, 4  ;;  %v439_v32 = vld [vmem:[%s2463_s16 + $0x1c] sm:$0x1]  ;;  %v467_v33 = vrot.slane %v465_v24, 5  ;;  %v473_v34 = vrot.slane %v471_v25, 5 }
  0x15   : > { %2145 = vmatpush3.bf16.msra.mxu0 %v2297_v4  ;;  %v476_v35 = vshrl.u32 %v2479_v22, 16  ;;  %v479_v36 = vshll.u32 %v2479_v22, 16  ;;  %v454_v37 = vor.u32 %v453_v29, %v450_v28  ;;  %v485_v38 = vshll.u32 %v438_v27, 16  ;;  %v2311_v61 = vld [vmem:[%s2807_s3 + $0xb8] sm:$0xff]   ;;  %v2313_v3 = vld [vmem:[%s2807_s3 + $0xb0] sm:$0xff]   ;;  %v2315_v16 = vld [vmem:[%s2807_s3 + $0xa8] sm:$0xff]  }
  0x16   : > { %2169 = vmatpush3.bf16.msra.mxu1 %v2298_v5  ;;  %2146 = vmatprep.subr.bf16.mxu0 %v2299_v6  ;;  %v490_v39 = vshrl.u32 %v2485_v26, 16  ;;  %v493_v40 = vshll.u32 %v2485_v26, 16  ;;  %v468_v43 = vor.u32 %v467_v33, %v464_v31  ;;  %v499_v46 = vshll.u32 %v439_v32, 16  ;;  %v2312_v63 = vld [vmem:[%s2807_s3 + $0xf8] sm:$0xff]   ;;  %v2314_v4 = vld [vmem:[%s2807_s3 + $0xf0] sm:$0xff]   ;;  %s1925_s29 = sshll.u32 %s2445_s23, 3 }
  0x17   : > { %2170 = vmatprep.subr.bf16.mxu1 %v2300_v7  ;;  %v478_v44 = vrot.slane %v476_v35, 4  ;;  %v481_v45 = vrot.slane %v479_v36, 5  ;;  %v455_v48 = vrot.slane %v454_v37, 4  ;;  %v487_v53 = vrot.slane %v485_v38, 5  ;;  %v416_v5 = vld [vmem:[%s2463_s16 + $0x20] sm:$0xf]  ;;  %s410_s13 = scalar_lea.vmem %s2813_s9, %s1925_s29 }
  0x18   : > { %v492_v49 = vrot.slane %v490_v39, 4  ;;  %v495_v50 = vrot.slane %v493_v40, 5  ;;  %v469_v51 = vrot.slane %v468_v43, 4  ;;  %v501_v56 = vrot.slane %v499_v46, 5  ;;  %v418_v24 = vld [vmem:[%s2463_s16 + $0x30] sm:$0xf] }
  0x19   : > { %2147 = vmatpush3.bf16.msra.mxu0 %v2299_v6  ;;  %v482_v52 = vor.u32 %v481_v45, %v478_v44  ;;  %v460_v54 = vsel %vm2498_vm2, %v455_v48, %v459_v30  ;;  %v1955_v2 = vcombine.low %v2479_v22, %v2485_v26  ;;  %v417_v6 = vld [vmem:[%s2463_s16 + $0x28] sm:$0xf]  ;;  %v419_v26 = vld [vmem:[%s2463_s16 + $0x38] sm:$0xf]  ;;  %v442_v27 = vld [vmem:[%s2463_s16 + $0x34] sm:$0x1] }
  0x1a   : > { %2171 = vmatpush3.bf16.msra.mxu1 %v2300_v7  ;;  %2148 = vmatprep.subr.bf16.mxu0 %v2301_v8  ;;  %v496_v55 = vor.u32 %v495_v50, %v492_v49  ;;  %v474_v57 = vsel %vm2498_vm2, %v469_v51, %v473_v34  ;;  %v440_v7 = vld [vmem:[%s2463_s16 + $0x24] sm:$0x1]  ;;  %v518_v13 = vshrl.u32 %v417_v6, 16  ;;  %v521_v14 = vshll.u32 %v417_v6, 16  ;;  %v443_v28 = vld [vmem:[%s2463_s16 + $0x3c] sm:$0x1] }
  0x1b   : > { %2172 = vmatprep.subr.bf16.mxu1 %v2302_v9  ;;  %v483_v58 = vrot.slane %v482_v52, 4  ;;  %v1942_v59 = vcombine.low %v460_v54, %v474_v57  ;;  %v513_v12 = vshll.u32 %v440_v7, 16  ;;  %v532_v30 = vshrl.u32 %v418_v24, 16  ;;  %v2317_v37 = vld [vmem:[%s2807_s3 + $0xa0] sm:$0xff]   ;;  %v2325_v7 = vld [vmem:[%s2807_s3 + $0x88] sm:$0xff]  }
  0x1c   : > { %v497_v60 = vrot.slane %v496_v55, 4  ;;  %v520_v21 = vrot.slane %v518_v13, 4  ;;  %v523_v22 = vrot.slane %v521_v14, 5  ;;  %v535_v31 = vshll.u32 %v418_v24, 16  ;;  %v2321_v55 = vld [vmem:[%s2807_s3 + $0xd8] sm:$0xff]  }
  0x1d   : > { %2149 = vmatpush3.bf16.msra.mxu0 %v2301_v8  ;;  %v488_v62 = vsel %vm2498_vm2, %v483_v58, %v487_v53  ;;  %2156 = vmatprep.mubr.bf16.mxu0 %v1942_v59  ;;  %v441_v8 = vld [vmem:[%s2463_s16 + $0x2c] sm:$0x1]  ;;  %v515_v20 = vrot.slane %v513_v12, 5  ;;  %v541_v32 = vshll.u32 %v442_v27, 16  ;;  %v546_v34 = vshrl.u32 %v419_v26, 16  ;;  %v2319_v53 = vld [vmem:[%s2807_s3 + $0x98] sm:$0xff]  }
  0x1e   : > { %2173 = vmatpush3.bf16.msra.mxu1 %v2302_v9  ;;  %2150 = vmatprep.subr.bf16.mxu0 %v2303_v10  ;;  %v502_v0 = vsel %vm2498_vm2, %v497_v60, %v501_v56  ;;  %v504_v9 = vshrl.u32 %v416_v5, 16  ;;  %v527_v15 = vshll.u32 %v441_v8, 16  ;;  %v524_v29 = vor.u32 %v523_v22, %v520_v21  ;;  %v2323_v58 = vld [vmem:[%s2807_s3 + $0x90] sm:$0xff]   ;;  %v2326_v22 = vld [vmem:[%s2807_s3 + $0xc8] sm:$0xff]   ;;  %v2585_v27 = vld [vmem:[%s2808_s4 + $0x38] sm:$0xff]  }
  0x1f   : > { %2174 = vmatprep.subr.bf16.mxu1 %v2304_v11  ;;  %v1943_v1 = vcombine.low %v488_v62, %v502_v0  ;;  %v549_v35 = vshll.u32 %v419_v26, 16  ;;  %v555_v36 = vshll.u32 %v443_v28, 16  ;;  %v534_v39 = vrot.slane %v532_v30, 4  ;;  %v2324_v60 = vld [vmem:[%s2807_s3 + $0xd0] sm:$0xff]   ;;  %v2003_v0 = vld [vmem:[%s2463_s16 + $0xc] sm:$0x1] }
  0x20   : > { %v506_v18 = vrot.slane %v504_v9, 4  ;;  %v525_v38 = vrot.slane %v524_v29, 4  ;;  %v537_v40 = vrot.slane %v535_v31, 5  ;;  %v543_v44 = vrot.slane %v541_v32, 5  ;;  %v2327_v32 = vld [vmem:[%s2807_s3 + $0x80] sm:$0xff]  }
  0x21   : > { %2151 = vmatpush3.bf16.msra.mxu0 %v2303_v10  ;;  %v507_v10 = vshll.u32 %v416_v5, 16  ;;  %v548_v45 = vrot.slane %v546_v34, 4  ;;  %v551_v46 = vrot.slane %v549_v35, 5  ;;  %v1957_v49 = vcombine.low %v418_v24, %v419_v26 }
  0x22   : > { %2175 = vmatpush3.bf16.msra.mxu1 %v2304_v11  ;;  %2152 = vmatprep.subr.bf16.mxu0 %v2305_v17  ;;  %v1956_v11 = vcombine.low %v416_v5, %v417_v6  ;;  %v538_v48 = vor.u32 %v537_v40, %v534_v39  ;;  %v557_v52 = vrot.slane %v555_v36, 5  ;;  %v1039_v5 = vshll.u32 %v2003_v0, 16  ;;  %v2593_v36 = vld [vmem:[%s2808_s4 + $0x30] sm:$0xff]   ;;  %v2328_v40 = vld [vmem:[%s2807_s3 + $0xc0] sm:$0xff]  }
  0x23   : > { %2176 = vmatprep.subr.bf16.mxu1 %v2306_v23  ;;  %v509_v19 = vrot.slane %v507_v10, 5  ;;  %v552_v51 = vor.u32 %v551_v46, %v548_v45  ;;  %v2006_v10 = vld [vmem:[%s2463_s16 + $0x18] sm:$0xf]  ;;  %v2010_v45 = vld [vmem:[%s2463_s16 + $0x28] sm:$0xf] }
  0x24   : > { %v539_v54 = vrot.slane %v538_v48, 4  ;;  %v1041_v14 = vrot.slane %v1039_v5, 5  ;;  %v1061_v21 = vshll.u32 %v2006_v10, 16  ;;  %v2011_v46 = vld [vmem:[%s2463_s16 + $0x2c] sm:$0x1]  ;;  %v1505_v48 = vunpack.c.h.bf16 %v2585_v27 }
  0x25   : > { %2153 = vmatpush3.bf16.msra.mxu0 %v2305_v17  ;;  %v2316_v17 = vld [vmem:[%s2807_s3 + $0xe8] sm:$0xff]   ;;  %v510_v25 = vor.u32 %v509_v19, %v506_v18  ;;  %v553_v56 = vrot.slane %v552_v51, 4  ;;  %v2009_v19 = vld [vmem:[%s2463_s16 + $0x24] sm:$0x1]  ;;  %v2012_v51 = vld [vmem:[%s2463_s16 + $0x30] sm:$0xf] }
  0x26   : > { %2177 = vmatpush3.bf16.msra.mxu1 %v2306_v23  ;;  %2154 = vmatprep.subr.bf16.mxu0 %v2307_v41  ;;  %v529_v23 = vrot.slane %v527_v15, 5  ;;  %v544_v57 = vsel %vm2498_vm2, %v539_v54, %v543_v44  ;;  %v1063_v30 = vrot.slane %v1061_v21, 5  ;;  %v1081_v31 = vshll.u32 %v2009_v19, 16  ;;  %v2333_v5 = vld [vmem:[%s2463_s16 + $0x28] ss:$8 sps:$4 sm:$0xff]  }
  0x27   : > { %2178 = vmatprep.subr.bf16.mxu1 %v2308_v47  ;;  %v511_v33 = vrot.slane %v510_v25, 4  ;;  %v558_v59 = vsel %vm2498_vm2, %v553_v56, %v557_v52  ;;  %v2013_v52 = vld [vmem:[%s2463_s16 + $0x34] sm:$0x1]  ;;  %v2014_v56 = vld [vmem:[%s2463_s16 + $0x38] sm:$0xf] }
  0x28   : > { %v1945_v62 = vcombine.low %v544_v57, %v558_v59  ;;  %v1083_v44 = vrot.slane %v1081_v31, 5  ;;  %v2330_v57 = vld [vmem:[%s2463_s16 + $0x18] ss:$8 sps:$4 sm:$0xff]   ;;  %v1089_v59 = vshll.u32 %v2010_v45, 16 }
  0x29   : > { %2155 = vmatpush3.bf16.msra.mxu0 %v2307_v41  ;;  %v2318_v41 = vld [vmem:[%s2807_s3 + $0xe0] sm:$0xff]   ;;  %v516_v43 = vsel %vm2498_vm2, %v511_v33, %v515_v20  ;;  %v1058_v20 = vshrl.u32 %v2006_v10, 16 }
  0x2a   : > { %2179 = vmatpush3.bf16.msra.mxu1 %v2308_v47  ;;  %2188 = vmatprep.subr.bf16.mxu0 %v2311_v61  ;;  %v530_v47 = vsel %vm2498_vm2, %v525_v38, %v529_v23 }
  0x2b   : > { %2212 = vmatprep.subr.bf16.mxu1 %v2312_v63  ;;  %v1944_v50 = vcombine.low %v516_v43, %v530_v47  ;;  %v1060_v29 = vrot.slane %v1058_v20, 4  ;;  %v1504_v47 = vunpack.c.l.bf16 %v2585_v27 }
  0x2c   : > { %2157 = vmatmul.mubr.bf16.vlgmr.msra.gmra.mxu0 %v1943_v1  ;;  %v2004_v1 = vld [vmem:[%s2463_s16 + $0x10] sm:$0xf] }
  0x2d   : > { %2181 = vmatmul.mubr.bf16.vlgmr.msra.gmra.mxu1 %v1955_v2  ;;  %2189 = vmatpush3.bf16.msra.mxu0 %v2311_v61  ;;  %v2329_v61 = vld [vmem:[%s2463_s16 + $0x8] ss:$8 sps:$4 sm:$0xff]   ;;  %v2005_v2 = vld [vmem:[%s2463_s16 + $0x14] sm:$0x1]  ;;  %v1044_v6 = vshrl.u32 %v2004_v1, 16  ;;  %v1047_v8 = vshll.u32 %v2004_v1, 16  ;;  %v1064_v38 = vor.u32 %v1063_v30, %v1060_v29 }
  0x2e   : > { %2213 = vmatpush3.bf16.msra.mxu1 %v2312_v63  ;;  %2190 = vmatprep.subr.bf16.mxu0 %v2313_v3  ;;  %v2002_v63 = vld [vmem:[%s2463_s16 + $0x8] sm:$0xf]  ;;  %v1053_v9 = vshll.u32 %v2005_v2, 16  ;;  %v1103_v1 = vshll.u32 %v2012_v51, 16  ;;  %v1109_v2 = vshll.u32 %v2013_v52, 16 }
  0x2f   : > { %2214 = vmatprep.subr.bf16.mxu1 %v2314_v4  ;;  %2184 = vmatprep.mubr.bf16.mxu1 %v1956_v11  ;;  %v2007_v11 = vld [vmem:[%s2463_s16 + $0x1c] sm:$0x1]  ;;  %v1046_v15 = vrot.slane %v1044_v6, 4  ;;  %v1091_v6 = vrot.slane %v1089_v59, 5  ;;  %v2334_v30 = vld [vmem:[%s2463_s16 + $0x38] ss:$8 sps:$4 sm:$0xff]  }
  0x30   : > { %2160 = vmatprep.mubr.bf16.mxu0 %v1944_v50  ;;  %v1055_v18 = vrot.slane %v1053_v9, 5  ;;  %v1067_v24 = vshll.u32 %v2007_v11, 16  ;;  %v1065_v50 = vrot.slane %v1064_v38, 4  ;;  %v2017_v9 = vld [vmem:[%s2463_s16 + $0x44] sm:$0x1]  ;;  %v1105_v10 = vrot.slane %v1103_v1, 5 }
  0x31   : > { %2191 = vmatpush3.bf16.msra.mxu0 %v2313_v3  ;;  %v1030_v3 = vshrl.u32 %v2002_v63, 16  ;;  %v1111_v11 = vrot.slane %v1109_v2, 5  ;;  %v1520_v38 = vmul.f32 %v1504_v47, %v1504_v47  ;;  %v2341_v47 = vld [vmem:[%s2624_s17] sm:$0xff]  }
  0x32   : > { %2215 = vmatpush3.bf16.msra.mxu1 %v2314_v4  ;;  %2192 = vmatprep.subr.bf16.mxu0 %v2315_v16  ;;  %v1033_v4 = vshll.u32 %v2002_v63, 16  ;;  %v1069_v39 = vrot.slane %v1067_v24, 5 }
  0x33   : > { %2216 = vmatprep.subr.bf16.mxu1 %v2316_v17  ;;  %v1032_v12 = vrot.slane %v1030_v3, 4  ;;  %v2016_v3 = vld [vmem:[%s2463_s16 + $0x40] sm:$0xf] }
  0x34   : > { %2161 = vmatmul.mubr.bf16.gmra.mxu0 %v1945_v62  ;;  %v1035_v13 = vrot.slane %v1033_v4, 5  ;;  %v2015_v62 = vld [vmem:[%s2463_s16 + $0x3c] sm:$0x1] }
  0x35   : > { %2193 = vmatpush3.bf16.msra.mxu0 %v2315_v16  ;;  %2185 = vmatmul.mubr.bf16.gmra.mxu1 %v1957_v49  ;;  %v2008_v16 = vld [vmem:[%s2463_s16 + $0x20] sm:$0xf]  ;;  %s2727_s16 = scalar_lea.vmem %s2811_s7, %s2681_s15 }
  0x36   : > { %2217 = vmatpush3.bf16.msra.mxu1 %v2316_v17  ;;  %2194 = vmatprep.subr.bf16.mxu0 %v2317_v37  ;;  %v1049_v17 = vrot.slane %v1047_v8, 5  ;;  %v1036_v23 = vor.u32 %v1035_v13, %v1032_v12  ;;  %v1072_v25 = vshrl.u32 %v2008_v16, 16  ;;  %v1075_v26 = vshll.u32 %v2008_v16, 16 }
  0x37   : > { %2218 = vmatprep.subr.bf16.mxu1 %v2318_v41  ;;  %2204 = vmatprep.mubr.bf16.mxu0 %v2329_v61  ;;  %v1100_v61 = vshrl.u32 %v2012_v51, 16  ;;  %v1114_v12 = vshrl.u32 %v2014_v56, 16  ;;  %v1117_v13 = vshll.u32 %v2014_v56, 16  ;;  %v1128_v16 = vshrl.u32 %v2016_v3, 16 }
  0x38   : > { %v1050_v28 = vor.u32 %v1049_v17, %v1046_v15  ;;  %v1037_v33 = vrot.slane %v1036_v23, 4  ;;  %v1074_v34 = vrot.slane %v1072_v25, 4  ;;  %v1077_v35 = vrot.slane %v1075_v26, 5 }
  0x39   : > { %2195 = vmatpush3.bf16.msra.mxu0 %v2317_v37  ;;  %v1102_v8 = vrot.slane %v1100_v61, 4  ;;  %v1123_v15 = vshll.u32 %v2015_v62, 16  ;;  %v1131_v17 = vshll.u32 %v2016_v3, 16  ;;  %v1116_v20 = vrot.slane %v1114_v12, 4 }
  0x3a   : > { %2219 = vmatpush3.bf16.msra.mxu1 %v2318_v41  ;;  %2196 = vmatprep.subr.bf16.mxu0 %v2319_v53  ;;  %v1051_v37 = vrot.slane %v1050_v28, 4  ;;  %v1042_v41 = vsel %vm2498_vm2, %v1037_v33, %v1041_v14  ;;  %v1078_v43 = vor.u32 %v1077_v35, %v1074_v34  ;;  %v1119_v21 = vrot.slane %v1117_v13, 5 }
  0x3b   : > { %2220 = vmatprep.subr.bf16.mxu1 %v2321_v55  ;;  %v1106_v19 = vor.u32 %v1105_v10, %v1102_v8  ;;  %v1130_v24 = vrot.slane %v1128_v16, 4  ;;  %v1133_v25 = vrot.slane %v1131_v17, 5  ;;  %v1125_v29 = vrot.slane %v1123_v15, 5  ;;  %v2342_v17 = vld [vmem:[%s2624_s17 + $0x8] sm:$0xff]  }
  0x3c   : > { %v1056_v49 = vsel %vm2498_vm2, %v1051_v37, %v1055_v18  ;;  %v1079_v54 = vrot.slane %v1078_v43, 4  ;;  %v1326_v18 = vld [vmem:[%s2808_s4 + $0x28] sm:$0xff]   ;;  %v1120_v28 = vor.u32 %v1119_v21, %v1116_v20  ;;  %v1324_v37 = vld [vmem:[%s2808_s4 + $0x20] sm:$0xff]  }
  0x3d   : > { %2197 = vmatpush3.bf16.msra.mxu0 %v2319_v53  ;;  %v2034_v53 = vcombine.low %v1042_v41, %v1056_v49  ;;  %v1107_v26 = vrot.slane %v1106_v19, 4  ;;  %v1503_v41 = vunpack.c.h.bf16 %v2593_v36 }
  0x3e   : > { %2221 = vmatpush3.bf16.msra.mxu1 %v2321_v55  ;;  %2198 = vmatprep.subr.bf16.mxu0 %v2323_v58  ;;  %v1086_v55 = vshrl.u32 %v2010_v45, 16  ;;  %v1084_v63 = vsel %vm2498_vm2, %v1079_v54, %v1083_v44  ;;  %v1121_v35 = vrot.slane %v1120_v28, 4  ;;  %v1500_v45 = vunpack.c.l.bf16 %v1326_v18 }
  0x3f   : > { %2222 = vmatprep.subr.bf16.mxu1 %v2324_v60  ;;  %2228 = vmatprep.mubr.bf16.mxu1 %v2034_v53  ;;  %v1112_v34 = vsel %vm2498_vm2, %v1107_v26, %v1111_v11  ;;  %v1519_v52 = vmul.f32 %v1503_v41, %v1503_v41  ;;  %v1498_v53 = vunpack.c.l.bf16 %v1324_v37  ;;  %v1499_v54 = vunpack.c.h.bf16 %v1324_v37  ;;  %v2348_v26 = vld [vmem:[%s2640_s22 + $0x18] sm:$0xff]  }
  0x40   : > { %v1088_v0 = vrot.slane %v1086_v55, 4  ;;  %v1126_v49 = vsel %vm2498_vm2, %v1121_v35, %v1125_v29  ;;  %v1516_v55 = vmul.f32 %v1500_v45, %v1500_v45 }
  0x41   : > { %2199 = vmatpush3.bf16.msra.mxu0 %v2323_v58  ;;  %v1070_v58 = vsel %vm2498_vm2, %v1065_v50, %v1069_v39  ;;  %v1521_v39 = vmul.f32 %v1505_v48, %v1505_v48  ;;  %v1322_v50 = vld [vmem:[%s2808_s4 + $0x18] sm:$0xff]   ;;  %v1514_v62 = vmul.f32 %v1498_v53, %v1498_v53 }
  0x42   : > { %2223 = vmatpush3.bf16.msra.mxu1 %v2324_v60  ;;  %2200 = vmatprep.subr.bf16.mxu0 %v2325_v7  ;;  %v1095_v60 = vshll.u32 %v2011_v46, 16  ;;  %v2035_v4 = vcombine.low %v1070_v58, %v1084_v63  ;;  %v1092_v14 = vor.u32 %v1091_v6, %v1088_v0  ;;  %v1501_v46 = vunpack.c.h.bf16 %v1326_v18  ;;  %v1320_v58 = vld [vmem:[%s2808_s4 + $0x10] sm:$0xff]   ;;  %v1318_v0 = vld [vmem:[%s2808_s4 + $0x8] sm:$0xff]   ;;  %v1316_v6 = vld [vmem:[%s2808_s4] sm:$0xff]  }
  0x43   : > { %2224 = vmatprep.subr.bf16.mxu1 %v2326_v22  ;;  %v1529_v51 = vpack.c.bf16 %v1521_v39, %v1520_v38  ;;  %v1496_v59 = vunpack.c.l.bf16 %v1322_v50  ;;  %v1515_v63 = vmul.f32 %v1499_v54, %v1499_v54  ;;  %v1494_v1 = vunpack.c.l.bf16 %v1320_v58 }
  0x44   : > { %v1093_v23 = vrot.slane %v1092_v14, 4  ;;  %v1517_v56 = vmul.f32 %v1501_v46, %v1501_v46  ;;  %v1495_v2 = vunpack.c.h.bf16 %v1320_v58  ;;  %v1493_v8 = vunpack.c.h.bf16 %v1318_v0 }
  0x45   : > { %2201 = vmatpush3.bf16.msra.mxu0 %v2325_v7  ;;  %v1097_v7 = vrot.slane %v1095_v60, 5  ;;  %v1497_v60 = vunpack.c.h.bf16 %v1322_v50  ;;  %v1526_v3 = vpack.c.bf16 %v1515_v63, %v1514_v62  ;;  %v1510_v10 = vmul.f32 %v1494_v1, %v1494_v1 }
  0x46   : > { %2225 = vmatpush3.bf16.msra.mxu1 %v2326_v22  ;;  %2202 = vmatprep.subr.bf16.mxu0 %v2327_v32  ;;  %v1137_v22 = vshll.u32 %v2017_v9, 16  ;;  %v1527_v61 = vpack.c.bf16 %v1517_v56, %v1516_v55  ;;  %v1511_v11 = vmul.f32 %v1495_v2, %v1495_v2  ;;  %v1490_v12 = vunpack.c.l.bf16 %v1316_v6 }
  0x47   : > { %2226 = vmatprep.subr.bf16.mxu1 %v2328_v40  ;;  %v1098_v31 = vsel %vm2498_vm2, %v1093_v23, %v1097_v7  ;;  %v1492_v7 = vunpack.c.l.bf16 %v1318_v0  ;;  %v1491_v13 = vunpack.c.h.bf16 %v1316_v6  ;;  %v1509_v16 = vmul.f32 %v1493_v8, %v1493_v8  ;;  %v2344_v23 = vld [vmem:[%s2624_s17 + $0x18] sm:$0xff]  }
  0x48   : > { %v1139_v33 = vrot.slane %v1137_v22, 5  ;;  %v2036_v43 = vcombine.low %v1098_v31, %v1112_v34  ;;  %v1524_v14 = vpack.c.bf16 %v1511_v11, %v1510_v10  ;;  %v1506_v20 = vmul.f32 %v1490_v12, %v1490_v12 }
  0x49   : > { %2203 = vmatpush3.bf16.msra.mxu0 %v2327_v32  ;;  %v1134_v32 = vor.u32 %v1133_v25, %v1130_v24  ;;  %v1508_v15 = vmul.f32 %v1492_v7, %v1492_v7  ;;  %v1507_v21 = vmul.f32 %v1491_v13, %v1491_v13  ;;  %v2346_v24 = vld [vmem:[%s2640_s22 + $0x8] sm:$0xff]   ;;  %v2347_v25 = vld [vmem:[%s2640_s22 + $0x10] sm:$0xff]  }
  0x4a   : > { %2227 = vmatpush3.bf16.msra.mxu1 %v2328_v40  ;;  %2236 = vmatprep.subr.bf16.mxu0 %v2585_v27  ;;  %v1502_v40 = vunpack.c.l.bf16 %v2593_v36 }
  0x4b   : > { %v1135_v44 = vrot.slane %v1134_v32, 4  ;;  %2260 = vmatprep.subr.bf16.mxu1 %v1529_v51  ;;  %v1523_v19 = vpack.c.bf16 %v1509_v16, %v1508_v15  ;;  %v1522_v22 = vpack.c.bf16 %v1507_v21, %v1506_v20 }
  0x4c   : > { %2205 = vmatmul.mubr.bf16.vlgmr.msra.gmra.mxu0 %v2330_v57  ;;  %v2345_v57 = vld [vmem:[%s2640_s22] sm:$0xff]  }
  0x4d   : > { %2237 = vmatpush3.bf16.msra.mxu0 %v2585_v27  ;;  %2229 = vmatmul.mubr.bf16.vlgmr.msra.gmra.mxu1 %v2035_v4  ;;  %v1140_v27 = vsel %vm2498_vm2, %v1135_v44, %v1139_v33  ;;  %v1512_v4 = vmul.f32 %v1496_v59, %v1496_v59 }
  0x4e   : > { %2238 = vmatprep.subr.bf16.mxu0 %v2593_v36  ;;  %2208 = vmatprep.mubr.bf16.mxu0 %v2333_v5  ;;  %v2037_v48 = vcombine.low %v1126_v49, %v1140_v27  ;;  %v1513_v5 = vmul.f32 %v1497_v60, %v1497_v60 }
  0x4f   : > { %2232 = vmatprep.mubr.bf16.mxu1 %v2036_v43  ;;  %2261 = vmatpush3.bf16.msra.mxu1 %v1529_v51  ;;  %v2046_v51 = vld [vmem:[%s2809_s5] ss:$0 sm:$0xff] }
  0x50   : > { %v1525_v9 = vpack.c.bf16 %v1513_v5, %v1512_v4 }
  0x51   : > { %2239 = vmatpush3.bf16.msra.mxu0 %v2593_v36  ;;  %v1518_v36 = vmul.f32 %v1502_v40, %v1502_v40 }
  0x52   : > { %2240 = vmatprep.subr.bf16.mxu0 %v1326_v18 }
  0x53   : > { %v1528_v42 = vpack.c.bf16 %v1519_v52, %v1518_v36 }
  0x54   : > { %2209 = vmatmul.mubr.bf16.gmra.mxu0 %v2334_v30 }
  0x55   : > { %2241 = vmatpush3.bf16.msra.mxu0 %v1326_v18  ;;  %2233 = vmatmul.mubr.bf16.gmra.mxu1 %v2037_v48  ;;  %v2343_v18 = vld [vmem:[%s2624_s17 + $0x10] sm:$0xff]  }
  0x56   : > { %2242 = vmatprep.subr.bf16.mxu0 %v1324_v37  ;;  %2252 = vmatprep.mubr.bf16.mxu0 %v2341_v47 }
  0x57   : > { %2262 = vmatprep.subr.bf16.mxu1 %v1528_v42  ;;  %2276 = vmatprep.mubr.bf16.mxu1 %v2345_v57 }
  0x58   : > { %2263 = vmatpush3.bf16.msra.mxu1 %v1528_v42 }
  0x59   : > { %2243 = vmatpush3.bf16.msra.mxu0 %v1324_v37  ;;  %2264 = vmatprep.subr.bf16.mxu1 %v1527_v61 }
  0x5a   : > { %2244 = vmatprep.subr.bf16.mxu0 %v1322_v50 }
  0x5c   : > { %2265 = vmatpush3.bf16.msra.mxu1 %v1527_v61 }
  0x5d   : > { %2245 = vmatpush3.bf16.msra.mxu0 %v1322_v50  ;;  %2266 = vmatprep.subr.bf16.mxu1 %v1526_v3 }
  0x5e   : > { %2246 = vmatprep.subr.bf16.mxu0 %v1320_v58 }
  0x60   : > { %2267 = vmatpush3.bf16.msra.mxu1 %v1526_v3 }
  0x61   : > { %2247 = vmatpush3.bf16.msra.mxu0 %v1320_v58  ;;  %2268 = vmatprep.subr.bf16.mxu1 %v1525_v9 }
  0x62   : > { %2248 = vmatprep.subr.bf16.mxu0 %v1318_v0 }
  0x64   : > { %2269 = vmatpush3.bf16.msra.mxu1 %v1525_v9 }
  0x65   : > { %2249 = vmatpush3.bf16.msra.mxu0 %v1318_v0  ;;  %2270 = vmatprep.subr.bf16.mxu1 %v1524_v14 }
  0x66   : > { %2250 = vmatprep.subr.bf16.mxu0 %v1316_v6 }
  0x68   : > { %2271 = vmatpush3.bf16.msra.mxu1 %v1524_v14 }
  0x69   : > { %2251 = vmatpush3.bf16.msra.mxu0 %v1316_v6  ;;  %2272 = vmatprep.subr.bf16.mxu1 %v1523_v19 }
  0x6c   : > { %2253 = vmatmul.mubr.bf16.vlgmr.msra.gmra.mxu0 %v2342_v17  ;;  %2273 = vmatpush3.bf16.msra.mxu1 %v1523_v19 }
  0x6d   : > { %2256 = vmatprep.mubr.bf16.mxu0 %v2343_v18  ;;  %2274 = vmatprep.subr.bf16.mxu1 %v1522_v22 }
  0x70   : > { %2275 = vmatpush3.bf16.msra.mxu1 %v1522_v22 }
  0x73   : > { %2277 = vmatmul.mubr.bf16.vlgmr.msra.gmra.mxu1 %v2346_v24 }
  0x74   : > { %2257 = vmatmul.mubr.bf16.gmra.mxu0 %v2344_v23  ;;  %2280 = vmatprep.mubr.bf16.mxu1 %v2347_v25 }
  0x7b   : > { %2281 = vmatmul.mubr.bf16.gmra.mxu1 %v2348_v26 }
  0xec   : > { %v2158_v28 = vpop.f32.mrf.mxu0 }
  0xed   : > { %v2182_v29 = vpop.f32.mrf.mxu1 }
  0xee   : > { %v674_v30 = vpop.f32.mrf.mxu0  ;;  %v820_v45 = vadd.f32 %v2182_v29, %v2158_v28 }
  0xef   : > { %v811_v31 = vpop.f32.mrf.mxu1 }
  0xf0   : > { %v2159_v32 = vpop.f32.mrf.mxu0  ;;  %v812_v27 = vadd.f32 %v811_v31, %v674_v30 }
  0xf1   : > { %v2183_v33 = vpop.f32.mrf.mxu1 }
  0xf2   : > { %v677_v34 = vpop.f32.mrf.mxu0  ;;  %v823_v36 = vadd.f32 %v2183_v33, %v2159_v32 }
  0xf3   : > { %v814_v35 = vpop.f32.mrf.mxu1 }
  0xf4   : > { %v2162_v37 = vpop.f32.mrf.mxu0  ;;  %v815_v56 = vadd.f32 %v814_v35, %v677_v34 }
  0xf5   : > { %v2186_v38 = vpop.f32.mrf.mxu1 }
  0xf6   : > { %v690_v39 = vpop.f32.mrf.mxu0  ;;  %v836_v61 = vadd.f32 %v2186_v38, %v2162_v37 }
  0xf7   : > { %v827_v40 = vpop.f32.mrf.mxu1 }
  0xf8   : > { %v2163_v41 = vpop.f32.mrf.mxu0  ;;  %v828_v3 = vadd.f32 %v827_v40, %v690_v39  ;;  %v2047_v39 = vld [vmem:[%s2809_s5 + $0x2] ss:$0 sm:$0xff] }
  0xf9   : > { %v2187_v43 = vpop.f32.mrf.mxu1 }
  0xfa   : > { %v693_v44 = vpop.f32.mrf.mxu0  ;;  %v839_v9 = vadd.f32 %v2187_v43, %v2163_v41 }
  0xfb   : > { %v830_v46 = vpop.f32.mrf.mxu1 }
  0xfc   : > { %v831_v14 = vadd.f32 %v830_v46, %v693_v44 }
 0x10c   : > { %v2206_v49 = vpop.f32.mrf.mxu0 }
 0x10d   : > { %v1007_v47 = vadd.f32 %v2206_v49, %v820_v45  ;;  %v2230_v48 = vpop.f32.mrf.mxu1 }
 0x10e   : > { %v974_v50 = vpop.f32.mrf.mxu0 }
 0x10f   : > { %v1005_v52 = vadd.f32 %v974_v50, %v812_v27  ;;  %v1289_v53 = vadd.f32 %v2230_v48, %v1007_v47  ;;  %v1256_v54 = vpop.f32.mrf.mxu1 }
 0x110   : > { %v2207_v55 = vpop.f32.mrf.mxu0 }
 0x111   : > { %v2692_v42 = vadd.f32 %v2046_v51, %v1289_v53  ;;  %v1008_v57 = vadd.f32 %v2207_v55, %v823_v36  ;;  %v1287_v58 = vadd.f32 %v1256_v54, %v1005_v52  ;;  %v2231_v59 = vpop.f32.mrf.mxu1 }
 0x112   : > { %v977_v60 = vpop.f32.mrf.mxu0 }
 0x113   : > { %1310 = vst [vmem:[%s2690_s20 + $0x10] sm:$0xff] %v2692_v42  ;;  %v2696_v62 = vadd.f32 %v2046_v51, %v1287_v58  ;;  %v1006_v63 = vadd.f32 %v977_v60, %v815_v56  ;;  %v1290_v0 = vadd.f32 %v2231_v59, %v1008_v57  ;;  %v1259_v1 = vpop.f32.mrf.mxu1 }
 0x114   : > { %v2210_v2 = vpop.f32.mrf.mxu0 }
 0x115   : > { %1308 = vst [vmem:[%s2690_s20] sm:$0xff] %v2696_v62  ;;  %v2700_v4 = vadd.f32 %v2046_v51, %v1290_v0  ;;  %v1011_v5 = vadd.f32 %v2210_v2, %v836_v61  ;;  %v1288_v6 = vadd.f32 %v1259_v1, %v1006_v63  ;;  %v2234_v7 = vpop.f32.mrf.mxu1 }
 0x116   : > { %v990_v8 = vpop.f32.mrf.mxu0 }
 0x117   : > { %1311 = vst [vmem:[%s2690_s20 + $0x18] sm:$0xff] %v2700_v4  ;;  %v1301_v10 = vadd.f32 %v2046_v51, %v1288_v6  ;;  %v1009_v11 = vadd.f32 %v990_v8, %v828_v3  ;;  %v1293_v12 = vadd.f32 %v2234_v7, %v1011_v5  ;;  %v1272_v13 = vpop.f32.mrf.mxu1 }
 0x118   : > { %v2211_v15 = vpop.f32.mrf.mxu0 }
 0x119   : > { %1309 = vst [vmem:[%s2690_s20 + $0x8] sm:$0xff] %v1301_v10  ;;  %v1635_v16 = vadd.f32 %v1301_v10, %v2696_v62  ;;  %v2706_v17 = vadd.f32 %v2046_v51, %v1293_v12  ;;  %v1012_v18 = vadd.f32 %v2211_v15, %v839_v9  ;;  %v1291_v19 = vadd.f32 %v1272_v13, %v1009_v11  ;;  %v2235_v20 = vpop.f32.mrf.mxu1 }
 0x11a   : > { %v993_v21 = vpop.f32.mrf.mxu0 }
 0x11b   : > { %v1636_v22 = vadd.f32 %v1635_v16, %v2692_v42  ;;  %1314 = vst [vmem:[%s2690_s20 + $0x30] sm:$0xff] %v2706_v17  ;;  %v1304_v23 = vadd.f32 %v2046_v51, %v1291_v19  ;;  %v1010_v24 = vadd.f32 %v993_v21, %v831_v14  ;;  %v1294_v25 = vadd.f32 %v2235_v20, %v1012_v18  ;;  %v1275_v26 = vpop.f32.mrf.mxu1 }
 0x11d   : > { %1312 = vst [vmem:[%s2690_s20 + $0x20] sm:$0xff] %v1304_v23  ;;  %v1637_v28 = vadd.f32 %v1636_v22, %v2700_v4  ;;  %v2713_v29 = vadd.f32 %v2046_v51, %v1294_v25  ;;  %v1292_v30 = vadd.f32 %v1275_v26, %v1010_v24 }
 0x11f   : > { %v1638_v31 = vadd.f32 %v1637_v28, %v1304_v23  ;;  %1315 = vst [vmem:[%s2690_s20 + $0x38] sm:$0xff] %v2713_v29  ;;  %v1305_v32 = vadd.f32 %v2046_v51, %v1292_v30 }
 0x121   : > { %1313 = vst [vmem:[%s2690_s20 + $0x28] sm:$0xff] %v1305_v32  ;;  %v1639_v33 = vadd.f32 %v1638_v31, %v1305_v32 }
 0x123   : > { %v1640_v34 = vadd.f32 %v1639_v33, %v2706_v17 }
 0x125   : > { %v1641_v35 = vadd.f32 %v1640_v34, %v2713_v29 }
 0x127   : > { %v1642_v37 = vrot.slane %v1641_v35, 4 }
 0x129   : > { %v1643_v38 = vadd.f32 %v1642_v37, %v1641_v35 }
 0x12b   : > { %v1644_v40 = vrot.slane %v1643_v38, 2 }
 0x12c   : > { %v2254_v41 = vpop.f32.mrf.mxu0 }
 0x12d   : > { %v1645_v43 = vadd.f32 %v1644_v40, %v1643_v38  ;;  %v2729_v44 = vadd.f32 %v2254_v41, %v2047_v39 }
 0x12e   : > { %v1451_v45 = vpop.f32.mrf.mxu0 }
 0x12f   : > { %v1646_v46 = vrot.slane %v1645_v43, 1  ;;  %1484 = vst [vmem:[%s2727_s16 + $0x10] sm:$0xff] %v2729_v44  ;;  %v2733_v49 = vadd.f32 %v2047_v39, %v1451_v45 }
 0x130   : > { %v2255_v27 = vpop.f32.mrf.mxu0 }
 0x131   : > { %v1647_v47 = vadd.f32 %v1646_v46, %v1645_v43  ;;  %1482 = vst [vmem:[%s2727_s16] sm:$0xff] %v2733_v49  ;;  %v2737_v48 = vadd.f32 %v2255_v27, %v2047_v39 }
 0x132   : > { %v1454_v50 = vpop.f32.mrf.mxu0 }
 0x133   : > { %v2739_v51 = vmul.f32 0.015625, %v1647_v47  ;;  %1485 = vst [vmem:[%s2727_s16 + $0x18] sm:$0xff] %v2737_v48  ;;  %v2743_v36 = vadd.f32 %v2047_v39, %v1454_v50  ;;  %v2278_v60 = vpop.f32.mrf.mxu1 }
 0x134   : > { %v2258_v52 = vpop.f32.mrf.mxu0  ;;  %1629 = vst [vmem:[%s2756_s28 + $0x10] sm:$0xff] %v2278_v60 }
 0x135   : > { %v1649_v53 = vsub.f32 %v2696_v62, %v2739_v51  ;;  %v1650_v54 = vsub.f32 %v1301_v10, %v2739_v51  ;;  %v1651_v55 = vsub.f32 %v2692_v42, %v2739_v51  ;;  %1483 = vst [vmem:[%s2727_s16 + $0x8] sm:$0xff] %v2743_v36  ;;  %v1652_v57 = vsub.f32 %v2700_v4, %v2739_v51  ;;  %v1596_v3 = vpop.f32.mrf.mxu1 }
 0x136   : > { %v1467_v56 = vpop.f32.mrf.mxu0  ;;  %v1653_v61 = vsub.f32 %v1304_v23, %v2739_v51  ;;  %v1678_v0 = vadd.f32 %v2743_v36, %v2733_v49  ;;  %v2764_v1 = vadd.f32 %v2258_v52, %v2047_v39  ;;  %v1654_v4 = vsub.f32 %v1305_v32, %v2739_v51  ;;  %1627 = vst [vmem:[%s2756_s28] sm:$0xff] %v1596_v3 }
 0x137   : > { %v1657_v58 = vmul.f32 %v1649_v53, %v1649_v53  ;;  %v1658_v59 = vmul.f32 %v1650_v54, %v1650_v54  ;;  %v1659_v42 = vmul.f32 %v1651_v55, %v1651_v55  ;;  %v1468_v2 = vadd.f32 %v2047_v39, %v1467_v56  ;;  %v2279_v11 = vpop.f32.mrf.mxu1 }
 0x138   : > { %v2259_v62 = vpop.f32.mrf.mxu0  ;;  %v1660_v7 = vmul.f32 %v1652_v57, %v1652_v57  ;;  %v1679_v9 = vadd.f32 %v1678_v0, %v2729_v44  ;;  %1488 = vst [vmem:[%s2727_s16 + $0x30] sm:$0xff] %v2764_v1  ;;  %1630 = vst [vmem:[%s2756_s28 + $0x18] sm:$0xff] %v2279_v11  ;;  %v1655_v12 = vsub.f32 %v2706_v17, %v2739_v51 }
 0x139   : > { %v1665_v63 = vadd.f32 %v1658_v59, %v1657_v58  ;;  %v2767_v5 = vadd.f32 %v2259_v62, %v2047_v39  ;;  %1486 = vst [vmem:[%s2727_s16 + $0x20] sm:$0xff] %v1468_v2  ;;  %v1661_v13 = vmul.f32 %v1653_v61, %v1653_v61  ;;  %v1599_v16 = vpop.f32.mrf.mxu1  ;;  %v1656_v18 = vsub.f32 %v2713_v29, %v2739_v51 }
 0x13a   : > { %v1470_v6 = vpop.f32.mrf.mxu0  ;;  %v1680_v15 = vadd.f32 %v1679_v9, %v2737_v48  ;;  %1628 = vst [vmem:[%s2756_s28 + $0x8] sm:$0xff] %v1599_v16  ;;  %v1662_v19 = vmul.f32 %v1654_v4, %v1654_v4  ;;  %v1663_v23 = vmul.f32 %v1655_v12, %v1655_v12 }
 0x13b   : > { %v1666_v8 = vadd.f32 %v1665_v63, %v1659_v42  ;;  %v1471_v10 = vadd.f32 %v2047_v39, %v1470_v6  ;;  %1489 = vst [vmem:[%s2727_s16 + $0x38] sm:$0xff] %v2767_v5  ;;  %v2282_v22 = vpop.f32.mrf.mxu1  ;;  %v1664_v26 = vmul.f32 %v1656_v18, %v1656_v18 }
 0x13c   : > { %v1681_v21 = vadd.f32 %v1680_v15, %v1468_v2  ;;  %1633 = vst [vmem:[%s2756_s28 + $0x30] sm:$0xff] %v2282_v22 }
 0x13d   : > { %v1667_v14 = vadd.f32 %v1666_v8, %v1660_v7  ;;  %1487 = vst [vmem:[%s2727_s16 + $0x28] sm:$0xff] %v1471_v10  ;;  %v1612_v25 = vpop.f32.mrf.mxu1 }
 0x13e   : > { %v1682_v24 = vadd.f32 %v1681_v21, %v1471_v10  ;;  %1631 = vst [vmem:[%s2756_s28 + $0x20] sm:$0xff] %v1612_v25 }
 0x13f   : > { %v1668_v20 = vadd.f32 %v1667_v14, %v1661_v13  ;;  %v2283_v31 = vpop.f32.mrf.mxu1 }
 0x140   : > { %v1683_v30 = vadd.f32 %v1682_v24, %v2764_v1  ;;  %1634 = vst [vmem:[%s2756_s28 + $0x38] sm:$0xff] %v2283_v31 }
 0x141   : > { %v1669_v17 = vadd.f32 %v1668_v20, %v1662_v19  ;;  %v1615_v33 = vpop.f32.mrf.mxu1 }
 0x142   : > { %v1684_v29 = vadd.f32 %v1683_v30, %v2767_v5  ;;  %1632 = vst [vmem:[%s2756_s28 + $0x28] sm:$0xff] %v1615_v33 }
 0x143   : > { %v1670_v28 = vadd.f32 %v1669_v17, %v1663_v23 }
 0x144   : > { %v1685_v34 = vrot.slane %v1684_v29, 4 }
 0x145   : > { %v1671_v32 = vadd.f32 %v1670_v28, %v1664_v26 }
 0x146   : > { %v1686_v35 = vadd.f32 %v1685_v34, %v1684_v29 }
 0x147   : > { %v1672_v27 = vrot.slane %v1671_v32, 4 }
 0x148   : > { %v1687_v37 = vrot.slane %v1686_v35, 2 }
 0x149   : > { %v1673_v56 = vadd.f32 %v1672_v27, %v1671_v32 }
 0x14a   : > { %v1688_v38 = vadd.f32 %v1687_v37, %v1686_v35 }
 0x14b   : > { %v1674_v42 = vrot.slane %v1673_v56, 2 }
 0x14c   : > { %v1689_v39 = vrot.slane %v1688_v38, 1 }
 0x14d   : > { %v1675_v0 = vadd.f32 %v1674_v42, %v1673_v56 }
 0x14e   : > { %v1690_v40 = vadd.f32 %v1689_v39, %v1688_v38 }
 0x14f   : > { %v1676_v6 = vrot.slane %v1675_v0, 1 }
 0x150   : > { %v1691_v41 = vmul.f32 0.015625, %v1690_v40 }
 0x151   : > { %v1677_v9 = vadd.f32 %v1676_v6, %v1675_v0 }
 0x152   : > { %v1692_v43 = vsub.f32 %v2733_v49, %v1691_v41  ;;  %v1693_v45 = vsub.f32 %v2743_v36, %v1691_v41  ;;  %v1694_v46 = vsub.f32 %v2729_v44, %v1691_v41  ;;  %v1695_v47 = vsub.f32 %v2737_v48, %v1691_v41 }
 0x153   : > { %v1696_v53 = vsub.f32 %v1468_v2, %v1691_v41  ;;  %v1697_v57 = vsub.f32 %v1471_v10, %v1691_v41  ;;  %v1698_v60 = vsub.f32 %v2764_v1, %v1691_v41  ;;  %v1699_v36 = vsub.f32 %v2767_v5, %v1691_v41 }
 0x154   : > { %v1700_v50 = vmul.f32 %v1692_v43, %v1692_v43  ;;  %v1701_v52 = vmul.f32 %v1693_v45, %v1693_v45  ;;  %v1702_v54 = vmul.f32 %v1694_v46, %v1694_v46  ;;  %v1703_v58 = vmul.f32 %v1695_v47, %v1695_v47 }
 0x155   : > { %v1704_v61 = vmul.f32 %v1696_v53, %v1696_v53  ;;  %v1705_v44 = vmul.f32 %v1697_v57, %v1697_v57  ;;  %v1706_v48 = vmul.f32 %v1698_v60, %v1698_v60  ;;  %v1707_v2 = vmul.f32 %v1699_v36, %v1699_v36 }
 0x156   : > { %v1708_v55 = vadd.f32 %v1701_v52, %v1700_v50  ;;  %v1722_v11 = vsel %vm1721_vm3, %v2739_v51, %v1677_v9 }
 0x157   : > { %v1724_v13 = vsel %vm1723_vm4, %v1722_v11, %v1691_v41 }
 0x158   : > { %v1709_v59 = vadd.f32 %v1708_v55, %v1702_v54 }
 0x15a   : > { %v1710_v49 = vadd.f32 %v1709_v59, %v1703_v58 }
 0x15c   : > { %v1711_v62 = vadd.f32 %v1710_v49, %v1704_v61 }
 0x15e   : > { %v1712_v63 = vadd.f32 %v1711_v62, %v1705_v44 }
 0x160   : > { %v1713_v3 = vadd.f32 %v1712_v63, %v1706_v48 }
 0x162   : > { %v1714_v4 = vadd.f32 %v1713_v3, %v1707_v2 }
 0x164   : > { %v1715_v7 = vrot.slane %v1714_v4, 4 }
 0x166   : > { %v1716_v8 = vadd.f32 %v1715_v7, %v1714_v4 }
 0x168   : > { %v1717_v10 = vrot.slane %v1716_v8, 2 }
 0x16a   : > { %v1718_v1 = vadd.f32 %v1717_v10, %v1716_v8 }
 0x16c   : > { %v1719_v5 = vrot.slane %v1718_v1, 1 }
 0x16e   : > { %v1720_v12 = vadd.f32 %v1719_v5, %v1718_v1 }
 0x170   : > { %v1726_v14 = vsel %vm1725_vm5, %v1724_v13, %v1720_v12 }
 0x171   : > { %v1728_v15 = vsel %vm1727_vm6, %v1726_v14, 0.0 }
 0x172   : > { %1729 = vst [vmem:[%s410_s13] sm:$0xff] %v1728_v15 }
 0x173 PF: > { %s20_s30 = sadd.s32 1, %s2363_s30  }
 0x174   : > { %p17_p5 = scmp.ge.s32.totalorder %s20_s30, 4  }
 0x176   :  { %19 = sbr.rel (!%p17_p5) target bundleno = 1 (0x1), region = 120 }

</bundles_post_ra>
